<compile_context>
chip_gen: v6e
topology: v6e:2x2x1
jax: 0.10.0
libtpu: 0.0.40
codegen_flags: <defaults>
</compile_context>

<pallas_src>
import jax
import jax.numpy as jnp
import numpy as np
from jax import lax
from jax.experimental import pallas as pl
from jax.experimental.pallas import tpu as pltpu

BN_EPS = 1e-5
NB_TARGET = 8          # images per grid step (amortizes step overhead; tiny VMEM footprint)
NEG = -3.0e38          # "-inf" pad value for the max-pool halo (never reaches the output)


# --------------------------------------------------------------------------------------
# Fused Node kernel: Nb batch elements per grid step, lane-dense (rows, W*C) compute.
#   x0_ref, x1_ref : (Nb, H, WC)     inputs of the two edges (WC = W*C)
#   m1/m2          : (3, WC, WC)     banded depthwise(kh) x pointwise x BN-scale matrices
#   b1/b2          : (1, WC)         folded BN bias, tiled over W
#   pscale/pbias   : (1, WC)         folded BN scale/bias for the pool edge, tiled over W
#   o_ref          : (Nb, H, WC)
#   pad_ref        : VMEM (Nb, H+2, WC)        conv halo scratch (zero border rows)
#   pool_ref       : VMEM (Nb, H+2, WC+2C)     pool halo scratch (-inf border rows/strips)
# --------------------------------------------------------------------------------------
def _make_node_kernel(C):
    def node_kernel(x0_ref, x1_ref, m1_ref, b1_ref, m2_ref, b2_ref,
                    pscale_ref, pbias_ref, o_ref, pad_ref, pool_ref):
        Nb, H, WC = o_ref.shape
        NbH = Nb * H

        # ---- halo init: borders only (interiors are overwritten right below) ----
        zrow = jnp.zeros((Nb, 1, WC), jnp.float32)
        pad_ref[:, 0:1, :] = zrow
        pad_ref[:, H + 1:H + 2, :] = zrow
        nrow = jnp.full((Nb, 1, WC + 2 * C), NEG, jnp.float32)
        pool_ref[:, 0:1, :] = nrow
        pool_ref[:, H + 1:H + 2, :] = nrow
        ncol = jnp.full((Nb, H, C), NEG, jnp.float32)
        pool_ref[:, 1:H + 1, 0:C] = ncol
        pool_ref[:, 1:H + 1, WC + C:WC + 2 * C] = ncol

        # Stage the pool edge's data early (separate scratch -> its VPU max work can
        # interleave under the conv stages' MXU matmuls).
        pool_ref[:, 1:H + 1, C:C + WC] = x1_ref[...].astype(jnp.float32)

        def sepconv_stage(x2d, m_ref, b_ref):
            # ReLU -> zero H-halo -> (depthwise 3x3 + pointwise 1x1 + BN scale) as three
            # banded (WC, WC) matmuls (one per kernel row kh) -> + folded BN bias.
            pad_ref[:, 1:H + 1, :] = jnp.maximum(x2d, 0.0).reshape(Nb, H, WC)
            acc = jnp.dot(pad_ref[:, 0:H, :].reshape(NbH, WC), m_ref[0],
                          preferred_element_type=jnp.float32)
            acc = acc + jnp.dot(pad_ref[:, 1:H + 1, :].reshape(NbH, WC), m_ref[1],
                                preferred_element_type=jnp.float32)
            acc = acc + jnp.dot(pad_ref[:, 2:H + 2, :].reshape(NbH, WC), m_ref[2],
                                preferred_element_type=jnp.float32)
            return acc + b_ref[0, :]

        # ---- edge 0: SepConv = two fused (ReLU -> dw3x3 -> pw1x1 -> BN) stages ----
        mid = sepconv_stage(x0_ref[...].reshape(NbH, WC).astype(jnp.float32),
                            m1_ref, b1_ref)
        out0 = sepconv_stage(mid, m2_ref, b2_ref)

        # ---- edge 1: MaxPool2d(3, stride=1, pad=1) -> BN(affine=False) as scale/bias ----
        m = pool_ref[:, 1:H + 1, C:C + WC]                      # center tap (real data)
        for kh in range(3):
            for kw in range(3):
                if kh == 1 and kw == 1:
                    continue
                m = jnp.maximum(m, pool_ref[:, kh:kh + H, kw * C:kw * C + WC])
        out1 = m * pscale_ref[0, :] + pbias_ref[0, :]

        # DropPath: identity (eval). input_switch (choose 2 of 2): sum.
        o_ref[...] = (out0.reshape(Nb, H, WC) + out1).astype(o_ref.dtype)

    return node_kernel


# --------------------------------------------------------------------------------------
# pallas_call plumbing (lane-dense (N, H, W*C) layout).
# --------------------------------------------------------------------------------------
def _node_pallas(x0f, x1f, m1, b1, m2, b2, pscale, pbias, C):
    N, H, WC = x0f.shape
    nb = min(N, NB_TARGET)
    n_pad = int(pl.cdiv(N, nb)) * nb
    if n_pad != N:
        padw = ((0, n_pad - N), (0, 0), (0, 0))
        x0f = jnp.pad(x0f, padw)
        x1f = jnp.pad(x1f, padw)

    img = pl.BlockSpec((nb, H, WC), lambda n: (n, 0, 0))
    mat = pl.BlockSpec((3, WC, WC), lambda n: (0, 0, 0))
    vec = pl.BlockSpec((1, WC), lambda n: (0, 0))

    out = pl.pallas_call(
        _make_node_kernel(C),
        out_shape=jax.ShapeDtypeStruct((n_pad, H, WC), x0f.dtype),
        grid=(n_pad // nb,),
        in_specs=[img, img, mat, vec, mat, vec, vec, vec],
        out_specs=img,
        scratch_shapes=[
            pltpu.VMEM((nb, H + 2, WC), jnp.float32),          # conv halo (zero borders)
            pltpu.VMEM((nb, H + 2, WC + 2 * C), jnp.float32),  # pool halo (-inf borders)
        ],
        # Per-step footprint (~1.5 MiB incl. double buffering) fits every generation's
        # default scoped VMEM (v5e 16 MiB, v6e/v7x 32 MiB) -> no vmem_limit override.
        compiler_params=pltpu.CompilerParams(
            dimension_semantics=("parallel",)),
    )(x0f, x1f, m1, b1, m2, b2, pscale, pbias)
    return out[:N] if n_pad != N else out


def _bn_fold(mean, var):
    inv = 1.0 / jnp.sqrt(var + BN_EPS)
    return inv, -mean * inv


def _banded_dwpw(dw, pwf, W):
    """Fold depthwise 3x3 (W-shifts as band offsets) + BN-scaled pointwise 1x1 into
    three banded (W*C, W*C) matrices, one per kernel row kh, for the lane-dense layout:
        M_kh[(w+kw-1)*C + ci, w*C + co] = dw[kh, kw, ci] * pwf[ci, co]
    dw: (3,3,C), pwf: (C,C) with the BN scale folded into output columns."""
    eye0 = jnp.eye(W, dtype=jnp.float32)
    eyep = jnp.eye(W, k=1, dtype=jnp.float32)    # source w-1 -> output w
    eyem = jnp.eye(W, k=-1, dtype=jnp.float32)   # source w+1 -> output w
    mats = []
    for kh in range(3):
        m = (jnp.kron(eyep, dw[kh, 0][:, None] * pwf)
             + jnp.kron(eye0, dw[kh, 1][:, None] * pwf)
             + jnp.kron(eyem, dw[kh, 2][:, None] * pwf))
        mats.append(m)
    return jnp.stack(mats, axis=0)   # (3, W*C, W*C)


@jax.jit
def node_forward_nhwc(x0, x1, params):
    """Hot-path API: NHWC inputs (N, H, W, C) for both edges."""
    N, H, W, C = x0.shape
    e0, e1 = params["edge0"], params["edge1"]
    inv1, bias1 = _bn_fold(e0["bn1_mean"], e0["bn1_var"])
    inv2, bias2 = _bn_fold(e0["bn2_mean"], e0["bn2_var"])
    pinv, pbias = _bn_fold(e1["bn_mean"], e1["bn_var"])
    m1 = _banded_dwpw(e0["dw1"], e0["pw1"] * inv1[None, :], W)
    m2 = _banded_dwpw(e0["dw2"], e0["pw2"] * inv2[None, :], W)
    b1 = jnp.tile(bias1, W)[None, :]
    b2 = jnp.tile(bias2, W)[None, :]
    ps = jnp.tile(pinv, W)[None, :]
    pb = jnp.tile(pbias, W)[None, :]
    # lane-dense flatten: (N, H, W, C) -> (N, H, W*C)   (free for contiguous NHWC)
    x0f = x0.reshape(N, H, W * C)
    x1f = x1.reshape(N, H, W * C)
    y = _node_pallas(x0f, x1f, m1, b1, m2, b2, ps, pb, C)
    return y.reshape(N, H, W, C)


@jax.jit
def node_forward(prev_nodes_nchw, params):
    # Public API keeps the PyTorch NCHW convention; transpose only at the boundary.
    # TODO(synk): keep the whole supernet NHWC/lane-dense and drop these transposes.
    x0 = jnp.transpose(prev_nodes_nchw[0], (0, 2, 3, 1))
    x1 = jnp.transpose(prev_nodes_nchw[1], (0, 2, 3, 1))
    y = node_forward_nhwc(x0, x1, params)
    return jnp.transpose(y, (0, 3, 1, 2))


# --------------------------------------------------------------------------------------
# Deterministic parameter init + pure-JAX reference (sanity check).
# --------------------------------------------------------------------------------------
def init_params(key, C):
    ks = jax.random.split(key, 10)
    edge0 = dict(
        dw1=jax.random.normal(ks[0], (3, 3, C), jnp.float32) * 0.2,
        pw1=jax.random.normal(ks[1], (C, C), jnp.float32) * 0.2,
        bn1_mean=jax.random.normal(ks[2], (C,), jnp.float32) * 0.1,
        bn1_var=jax.random.uniform(ks[3], (C,), jnp.float32, 0.5, 1.5),
        dw2=jax.random.normal(ks[4], (3, 3, C), jnp.float32) * 0.2,
        pw2=jax.random.normal(ks[5], (C, C), jnp.float32) * 0.2,
        bn2_mean=jax.random.normal(ks[6], (C,), jnp.float32) * 0.1,
        bn2_var=jax.random.uniform(ks[7], (C,), jnp.float32, 0.5, 1.5),
    )
    edge1 = dict(
        bn_mean=jax.random.normal(ks[8], (C,), jnp.float32) * 0.1,
        bn_var=jax.random.uniform(ks[9], (C,), jnp.float32, 0.5, 1.5),
    )
    return dict(edge0=edge0, edge1=edge1)


def _ref_dilconv(x, dw, pw, mean, var):
    C = x.shape[-1]
    x = jnp.maximum(x, 0.0)
    y = lax.conv_general_dilated(
        x, dw.reshape(3, 3, 1, C), window_strides=(1, 1), padding=((1, 1), (1, 1)),
        dimension_numbers=("NHWC", "HWIO", "NHWC"), feature_group_count=C,
        precision=lax.Precision.HIGHEST)
    y = lax.conv_general_dilated(
        y, pw.reshape(1, 1, C, C), window_strides=(1, 1), padding="VALID",
        dimension_numbers=("NHWC", "HWIO", "NHWC"),
        precision=lax.Precision.HIGHEST)
    return (y - mean) / jnp.sqrt(var + BN_EPS)


def node_forward_ref(prev_nodes_nchw, params):
    x0 = jnp.transpose(prev_nodes_nchw[0], (0, 2, 3, 1))
    x1 = jnp.transpose(prev_nodes_nchw[1], (0, 2, 3, 1))
    p = params["edge0"]
    o0 = _ref_dilconv(x0, p["dw1"], p["pw1"], p["bn1_mean"], p["bn1_var"])
    o0 = _ref_dilconv(o0, p["dw2"], p["pw2"], p["bn2_mean"], p["bn2_var"])
    o1 = lax.reduce_window(x1, -jnp.inf, lax.max, (1, 3, 3, 1), (1, 1, 1, 1),
                           ((0, 0), (1, 1), (1, 1), (0, 0)))
    o1 = (o1 - params["edge1"]["bn_mean"]) / jnp.sqrt(params["edge1"]["bn_var"] + BN_EPS)
    return jnp.transpose(o0 + o1, (0, 3, 1, 2))


if __name__ == "__main__":
    N, C, H, W = 2, 8, 16, 16
    key = jax.random.PRNGKey(0)
    k_x0, k_x1, k_p = jax.random.split(key, 3)
    # prev_nodes: two feature maps in PyTorch NCHW layout.
    x0 = jax.random.normal(k_x0, (N, C, H, W), jnp.float32)
    x1 = jax.random.normal(k_x1, (N, C, H, W), jnp.float32)
    params = init_params(k_p, C)

    out = jax.block_until_ready(node_forward((x0, x1), params))
    ref = jax.block_until_ready(node_forward_ref((x0, x1), params))

    # Tolerance allows for the MXU's f32 pass decomposition in the fused banded matmuls.
    np.testing.assert_allclose(np.asarray(out), np.asarray(ref), rtol=1e-2, atol=1e-2)
    assert out.shape == (N, C, H, W)
    print("KERNEL_OK")
</pallas_src>

<mosaic_0001>
module attributes {stable_mosaic.version = 11 : i64} {
  func.func @node_kernel(%arg0: i32, %arg1: memref<2x16x128xf32, #tpu.memory_space<vmem>>, %arg2: memref<2x16x128xf32, #tpu.memory_space<vmem>>, %arg3: memref<3x128x128xf32, #tpu.memory_space<vmem>>, %arg4: memref<1x128xf32, #tpu.memory_space<vmem>>, %arg5: memref<3x128x128xf32, #tpu.memory_space<vmem>>, %arg6: memref<1x128xf32, #tpu.memory_space<vmem>>, %arg7: memref<1x128xf32, #tpu.memory_space<vmem>>, %arg8: memref<1x128xf32, #tpu.memory_space<vmem>>, %arg9: memref<2x16x128xf32, #tpu.memory_space<vmem>>, %arg10: memref<2x18x128xf32, #tpu.memory_space<vmem>>, %arg11: memref<2x18x144xf32, #tpu.memory_space<vmem>>) attributes {dimension_semantics = [#tpu.dimension_semantics<parallel>], iteration_bounds = array<i64: 1>, scalar_prefetch = 0 : i64, scratch_operands = 2 : i64, tpu.core_type = #tpu.core_type<tc>, window_params = [{transform_indices = @transform_0, window_bounds = array<i64: 2, 16, 128>}, {transform_indices = @transform_1, window_bounds = array<i64: 2, 16, 128>}, {pipeline_mode = #tpu.pipeline_mode<synchronous>, transform_indices = @transform_2, window_bounds = array<i64: 3, 128, 128>}, {pipeline_mode = #tpu.pipeline_mode<synchronous>, transform_indices = @transform_3, window_bounds = array<i64: 1, 128>}, {pipeline_mode = #tpu.pipeline_mode<synchronous>, transform_indices = @transform_4, window_bounds = array<i64: 3, 128, 128>}, {pipeline_mode = #tpu.pipeline_mode<synchronous>, transform_indices = @transform_5, window_bounds = array<i64: 1, 128>}, {pipeline_mode = #tpu.pipeline_mode<synchronous>, transform_indices = @transform_6, window_bounds = array<i64: 1, 128>}, {pipeline_mode = #tpu.pipeline_mode<synchronous>, transform_indices = @transform_7, window_bounds = array<i64: 1, 128>}, {transform_indices = @transform_8, window_bounds = array<i64: 2, 16, 128>}]} {
    %cst = arith.constant 0.000000e+00 : f32
    %0 = vector.broadcast %cst : f32 to vector<2x1x128xf32>
    %c0 = arith.constant 0 : index
    %c0_0 = arith.constant 0 : index
    %c0_1 = arith.constant 0 : index
    %1 = vector.load %arg10[%c0, %c0_0, %c0_1] : memref<2x18x128xf32, #tpu.memory_space<vmem>>, vector<2x1x128xf32>
    tpu.vector_store %arg10[%c0, %c0_0, %c0_1], %0 {strides = array<i32>} : memref<2x18x128xf32, #tpu.memory_space<vmem>>, vector<2x1x128xf32>,
    %c0_2 = arith.constant 0 : index
    %c17 = arith.constant 17 : index
    %c0_3 = arith.constant 0 : index
    %2 = vector.load %arg10[%c0_2, %c17, %c0_3] : memref<2x18x128xf32, #tpu.memory_space<vmem>>, vector<2x1x128xf32>
    tpu.vector_store %arg10[%c0_2, %c17, %c0_3], %0 {strides = array<i32>} : memref<2x18x128xf32, #tpu.memory_space<vmem>>, vector<2x1x128xf32>,
    %cst_4 = arith.constant -3.000000e+38 : f32
    %3 = vector.broadcast %cst_4 : f32 to vector<2x1x144xf32>
    %c0_5 = arith.constant 0 : index
    %c0_6 = arith.constant 0 : index
    %c0_7 = arith.constant 0 : index
    %4 = vector.load %arg11[%c0_5, %c0_6, %c0_7] : memref<2x18x144xf32, #tpu.memory_space<vmem>>, vector<2x1x144xf32>
    tpu.vector_store %arg11[%c0_5, %c0_6, %c0_7], %3 {strides = array<i32>} : memref<2x18x144xf32, #tpu.memory_space<vmem>>, vector<2x1x144xf32>,
    %c0_8 = arith.constant 0 : index
    %c17_9 = arith.constant 17 : index
    %c0_10 = arith.constant 0 : index
    %5 = vector.load %arg11[%c0_8, %c17_9, %c0_10] : memref<2x18x144xf32, #tpu.memory_space<vmem>>, vector<2x1x144xf32>
    tpu.vector_store %arg11[%c0_8, %c17_9, %c0_10], %3 {strides = array<i32>} : memref<2x18x144xf32, #tpu.memory_space<vmem>>, vector<2x1x144xf32>,
    %cst_11 = arith.constant -3.000000e+38 : f32
    %6 = vector.broadcast %cst_11 : f32 to vector<2x16x8xf32>
    %c0_12 = arith.constant 0 : index
    %c1 = arith.constant 1 : index
    %c0_13 = arith.constant 0 : index
    %7 = vector.load %arg11[%c0_12, %c1, %c0_13] : memref<2x18x144xf32, #tpu.memory_space<vmem>>, vector<2x16x8xf32>
    tpu.vector_store %arg11[%c0_12, %c1, %c0_13], %6 {strides = array<i32>} : memref<2x18x144xf32, #tpu.memory_space<vmem>>, vector<2x16x8xf32>,
    %c0_14 = arith.constant 0 : index
    %c1_15 = arith.constant 1 : index
    %c136 = arith.constant 136 : index
    %8 = vector.load %arg11[%c0_14, %c1_15, %c136] : memref<2x18x144xf32, #tpu.memory_space<vmem>>, vector<2x16x8xf32>
    tpu.vector_store %arg11[%c0_14, %c1_15, %c136], %6 {strides = array<i32>} : memref<2x18x144xf32, #tpu.memory_space<vmem>>, vector<2x16x8xf32>,
    %c0_16 = arith.constant 0 : index
    %c0_17 = arith.constant 0 : index
    %c0_18 = arith.constant 0 : index
    %9 = vector.load %arg2[%c0_16, %c0_17, %c0_18] : memref<2x16x128xf32, #tpu.memory_space<vmem>>, vector<2x16x128xf32>
    %c0_19 = arith.constant 0 : index
    %c1_20 = arith.constant 1 : index
    %c8 = arith.constant 8 : index
    %10 = vector.load %arg11[%c0_19, %c1_20, %c8] : memref<2x18x144xf32, #tpu.memory_space<vmem>>, vector<2x16x128xf32>
    tpu.vector_store %arg11[%c0_19, %c1_20, %c8], %9 {strides = array<i32>} : memref<2x18x144xf32, #tpu.memory_space<vmem>>, vector<2x16x128xf32>,
    %c0_21 = arith.constant 0 : index
    %c0_22 = arith.constant 0 : index
    %c0_23 = arith.constant 0 : index
    %11 = vector.load %arg1[%c0_21, %c0_22, %c0_23] : memref<2x16x128xf32, #tpu.memory_space<vmem>>, vector<2x16x128xf32>
    %12 = vector.shape_cast %11 : vector<2x16x128xf32> to vector<32x128xf32>
    %cst_24 = arith.constant 0.000000e+00 : f32
    %13 = vector.broadcast %cst_24 : f32 to vector<32x128xf32>
    %14 = arith.maximumf %12, %13 : vector<32x128xf32>
    %15 = vector.shape_cast %14 : vector<32x128xf32> to vector<2x16x128xf32>
    %c0_25 = arith.constant 0 : index
    %c1_26 = arith.constant 1 : index
    %c0_27 = arith.constant 0 : index
    %16 = vector.load %arg10[%c0_25, %c1_26, %c0_27] : memref<2x18x128xf32, #tpu.memory_space<vmem>>, vector<2x16x128xf32>
    tpu.vector_store %arg10[%c0_25, %c1_26, %c0_27], %15 {strides = array<i32>} : memref<2x18x128xf32, #tpu.memory_space<vmem>>, vector<2x16x128xf32>,
    %c0_28 = arith.constant 0 : index
    %c0_29 = arith.constant 0 : index
    %c0_30 = arith.constant 0 : index
    %17 = vector.load %arg10[%c0_28, %c0_29, %c0_30] : memref<2x18x128xf32, #tpu.memory_space<vmem>>, vector<2x16x128xf32>
    %18 = vector.shape_cast %17 : vector<2x16x128xf32> to vector<32x128xf32>
    %c0_31 = arith.constant 0 : index
    %c0_32 = arith.constant 0 : index
    %c0_33 = arith.constant 0 : index
    %19 = vector.load %arg3[%c0_31, %c0_32, %c0_33] : memref<3x128x128xf32, #tpu.memory_space<vmem>>, vector<1x128x128xf32>
    %20 = vector.shape_cast %19 : vector<1x128x128xf32> to vector<128x128xf32>
    %cst_34 = arith.constant dense<0.000000e+00> : vector<32x128xf32>
    %21 = tpu.matmul %18, %20, %cst_34 {dimension_numbers = #tpu.dot_dimension_numbers<[1], [0], [0], [1], [0, 0, 1, 1], [], []>} : vector<32x128xf32>, vector<128x128xf32>, vector<32x128xf32> -> vector<32x128xf32>
    %c0_35 = arith.constant 0 : index
    %c1_36 = arith.constant 1 : index
    %c0_37 = arith.constant 0 : index
    %22 = vector.load %arg10[%c0_35, %c1_36, %c0_37] : memref<2x18x128xf32, #tpu.memory_space<vmem>>, vector<2x16x128xf32>
    %23 = vector.shape_cast %22 : vector<2x16x128xf32> to vector<32x128xf32>
    %c1_38 = arith.constant 1 : index
    %c0_39 = arith.constant 0 : index
    %c0_40 = arith.constant 0 : index
    %24 = vector.load %arg3[%c1_38, %c0_39, %c0_40] : memref<3x128x128xf32, #tpu.memory_space<vmem>>, vector<1x128x128xf32>
    %25 = vector.shape_cast %24 : vector<1x128x128xf32> to vector<128x128xf32>
    %cst_41 = arith.constant dense<0.000000e+00> : vector<32x128xf32>
    %26 = tpu.matmul %23, %25, %cst_41 {dimension_numbers = #tpu.dot_dimension_numbers<[1], [0], [0], [1], [0, 0, 1, 1], [], []>} : vector<32x128xf32>, vector<128x128xf32>, vector<32x128xf32> -> vector<32x128xf32>
    %27 = arith.addf %21, %26 : vector<32x128xf32>
    %c0_42 = arith.constant 0 : index
    %c2 = arith.constant 2 : index
    %c0_43 = arith.constant 0 : index
    %28 = vector.load %arg10[%c0_42, %c2, %c0_43] : memref<2x18x128xf32, #tpu.memory_space<vmem>>, vector<2x16x128xf32>
    %29 = vector.shape_cast %28 : vector<2x16x128xf32> to vector<32x128xf32>
    %c2_44 = arith.constant 2 : index
    %c0_45 = arith.constant 0 : index
    %c0_46 = arith.constant 0 : index
    %30 = vector.load %arg3[%c2_44, %c0_45, %c0_46] : memref<3x128x128xf32, #tpu.memory_space<vmem>>, vector<1x128x128xf32>
    %31 = vector.shape_cast %30 : vector<1x128x128xf32> to vector<128x128xf32>
    %cst_47 = arith.constant dense<0.000000e+00> : vector<32x128xf32>
    %32 = tpu.matmul %29, %31, %cst_47 {dimension_numbers = #tpu.dot_dimension_numbers<[1], [0], [0], [1], [0, 0, 1, 1], [], []>} : vector<32x128xf32>, vector<128x128xf32>, vector<32x128xf32> -> vector<32x128xf32>
    %33 = arith.addf %27, %32 : vector<32x128xf32>
    %c0_48 = arith.constant 0 : index
    %c0_49 = arith.constant 0 : index
    %34 = vector.load %arg4[%c0_48, %c0_49] : memref<1x128xf32, #tpu.memory_space<vmem>>, vector<1x128xf32>
    %35 = vector.shape_cast %34 : vector<1x128xf32> to vector<128xf32>
    %36 = vector.shape_cast %35 : vector<128xf32> to vector<1x128xf32>
    %37 = vector.broadcast %36 : vector<1x128xf32> to vector<32x128xf32>
    %38 = arith.addf %33, %37 : vector<32x128xf32>
    %cst_50 = arith.constant 0.000000e+00 : f32
    %39 = vector.broadcast %cst_50 : f32 to vector<32x128xf32>
    %40 = arith.maximumf %38, %39 : vector<32x128xf32>
    %41 = vector.shape_cast %40 : vector<32x128xf32> to vector<2x16x128xf32>
    %c0_51 = arith.constant 0 : index
    %c1_52 = arith.constant 1 : index
    %c0_53 = arith.constant 0 : index
    %42 = vector.load %arg10[%c0_51, %c1_52, %c0_53] : memref<2x18x128xf32, #tpu.memory_space<vmem>>, vector<2x16x128xf32>
    tpu.vector_store %arg10[%c0_51, %c1_52, %c0_53], %41 {strides = array<i32>} : memref<2x18x128xf32, #tpu.memory_space<vmem>>, vector<2x16x128xf32>,
    %c0_54 = arith.constant 0 : index
    %c0_55 = arith.constant 0 : index
    %c0_56 = arith.constant 0 : index
    %43 = vector.load %arg10[%c0_54, %c0_55, %c0_56] : memref<2x18x128xf32, #tpu.memory_space<vmem>>, vector<2x16x128xf32>
    %44 = vector.shape_cast %43 : vector<2x16x128xf32> to vector<32x128xf32>
    %c0_57 = arith.constant 0 : index
    %c0_58 = arith.constant 0 : index
    %c0_59 = arith.constant 0 : index
    %45 = vector.load %arg5[%c0_57, %c0_58, %c0_59] : memref<3x128x128xf32, #tpu.memory_space<vmem>>, vector<1x128x128xf32>
    %46 = vector.shape_cast %45 : vector<1x128x128xf32> to vector<128x128xf32>
    %cst_60 = arith.constant dense<0.000000e+00> : vector<32x128xf32>
    %47 = tpu.matmul %44, %46, %cst_60 {dimension_numbers = #tpu.dot_dimension_numbers<[1], [0], [0], [1], [0, 0, 1, 1], [], []>} : vector<32x128xf32>, vector<128x128xf32>, vector<32x128xf32> -> vector<32x128xf32>
    %c0_61 = arith.constant 0 : index
    %c1_62 = arith.constant 1 : index
    %c0_63 = arith.constant 0 : index
    %48 = vector.load %arg10[%c0_61, %c1_62, %c0_63] : memref<2x18x128xf32, #tpu.memory_space<vmem>>, vector<2x16x128xf32>
    %49 = vector.shape_cast %48 : vector<2x16x128xf32> to vector<32x128xf32>
    %c1_64 = arith.constant 1 : index
    %c0_65 = arith.constant 0 : index
    %c0_66 = arith.constant 0 : index
    %50 = vector.load %arg5[%c1_64, %c0_65, %c0_66] : memref<3x128x128xf32, #tpu.memory_space<vmem>>, vector<1x128x128xf32>
    %51 = vector.shape_cast %50 : vector<1x128x128xf32> to vector<128x128xf32>
    %cst_67 = arith.constant dense<0.000000e+00> : vector<32x128xf32>
    %52 = tpu.matmul %49, %51, %cst_67 {dimension_numbers = #tpu.dot_dimension_numbers<[1], [0], [0], [1], [0, 0, 1, 1], [], []>} : vector<32x128xf32>, vector<128x128xf32>, vector<32x128xf32> -> vector<32x128xf32>
    %53 = arith.addf %47, %52 : vector<32x128xf32>
    %c0_68 = arith.constant 0 : index
    %c2_69 = arith.constant 2 : index
    %c0_70 = arith.constant 0 : index
    %54 = vector.load %arg10[%c0_68, %c2_69, %c0_70] : memref<2x18x128xf32, #tpu.memory_space<vmem>>, vector<2x16x128xf32>
    %55 = vector.shape_cast %54 : vector<2x16x128xf32> to vector<32x128xf32>
    %c2_71 = arith.constant 2 : index
    %c0_72 = arith.constant 0 : index
    %c0_73 = arith.constant 0 : index
    %56 = vector.load %arg5[%c2_71, %c0_72, %c0_73] : memref<3x128x128xf32, #tpu.memory_space<vmem>>, vector<1x128x128xf32>
    %57 = vector.shape_cast %56 : vector<1x128x128xf32> to vector<128x128xf32>
    %cst_74 = arith.constant dense<0.000000e+00> : vector<32x128xf32>
    %58 = tpu.matmul %55, %57, %cst_74 {dimension_numbers = #tpu.dot_dimension_numbers<[1], [0], [0], [1], [0, 0, 1, 1], [], []>} : vector<32x128xf32>, vector<128x128xf32>, vector<32x128xf32> -> vector<32x128xf32>
    %59 = arith.addf %53, %58 : vector<32x128xf32>
    %c0_75 = arith.constant 0 : index
    %c0_76 = arith.constant 0 : index
    %60 = vector.load %arg6[%c0_75, %c0_76] : memref<1x128xf32, #tpu.memory_space<vmem>>, vector<1x128xf32>
    %61 = vector.shape_cast %60 : vector<1x128xf32> to vector<128xf32>
    %62 = vector.shape_cast %61 : vector<128xf32> to vector<1x128xf32>
    %63 = vector.broadcast %62 : vector<1x128xf32> to vector<32x128xf32>
    %64 = arith.addf %59, %63 : vector<32x128xf32>
    %c0_77 = arith.constant 0 : index
    %c1_78 = arith.constant 1 : index
    %c8_79 = arith.constant 8 : index
    %65 = vector.load %arg11[%c0_77, %c1_78, %c8_79] : memref<2x18x144xf32, #tpu.memory_space<vmem>>, vector<2x16x128xf32>
    %c0_80 = arith.constant 0 : index
    %c0_81 = arith.constant 0 : index
    %c0_82 = arith.constant 0 : index
    %66 = vector.load %arg11[%c0_80, %c0_81, %c0_82] : memref<2x18x144xf32, #tpu.memory_space<vmem>>, vector<2x16x128xf32>
    %67 = arith.maximumf %65, %66 : vector<2x16x128xf32>
    %c0_83 = arith.constant 0 : index
    %c0_84 = arith.constant 0 : index
    %c8_85 = arith.constant 8 : index
    %68 = vector.load %arg11[%c0_83, %c0_84, %c8_85] : memref<2x18x144xf32, #tpu.memory_space<vmem>>, vector<2x16x128xf32>
    %69 = arith.maximumf %67, %68 : vector<2x16x128xf32>
    %c0_86 = arith.constant 0 : index
    %c0_87 = arith.constant 0 : index
    %c16 = arith.constant 16 : index
    %70 = vector.load %arg11[%c0_86, %c0_87, %c16] : memref<2x18x144xf32, #tpu.memory_space<vmem>>, vector<2x16x128xf32>
    %71 = arith.maximumf %69, %70 : vector<2x16x128xf32>
    %c0_88 = arith.constant 0 : index
    %c1_89 = arith.constant 1 : index
    %c0_90 = arith.constant 0 : index
    %72 = vector.load %arg11[%c0_88, %c1_89, %c0_90] : memref<2x18x144xf32, #tpu.memory_space<vmem>>, vector<2x16x128xf32>
    %73 = arith.maximumf %71, %72 : vector<2x16x128xf32>
    %c0_91 = arith.constant 0 : index
    %c1_92 = arith.constant 1 : index
    %c16_93 = arith.constant 16 : index
    %74 = vector.load %arg11[%c0_91, %c1_92, %c16_93] : memref<2x18x144xf32, #tpu.memory_space<vmem>>, vector<2x16x128xf32>
    %75 = arith.maximumf %73, %74 : vector<2x16x128xf32>
    %c0_94 = arith.constant 0 : index
    %c2_95 = arith.constant 2 : index
    %c0_96 = arith.constant 0 : index
    %76 = vector.load %arg11[%c0_94, %c2_95, %c0_96] : memref<2x18x144xf32, #tpu.memory_space<vmem>>, vector<2x16x128xf32>
    %77 = arith.maximumf %75, %76 : vector<2x16x128xf32>
    %c0_97 = arith.constant 0 : index
    %c2_98 = arith.constant 2 : index
    %c8_99 = arith.constant 8 : index
    %78 = vector.load %arg11[%c0_97, %c2_98, %c8_99] : memref<2x18x144xf32, #tpu.memory_space<vmem>>, vector<2x16x128xf32>
    %79 = arith.maximumf %77, %78 : vector<2x16x128xf32>
    %c0_100 = arith.constant 0 : index
    %c2_101 = arith.constant 2 : index
    %c16_102 = arith.constant 16 : index
    %80 = vector.load %arg11[%c0_100, %c2_101, %c16_102] : memref<2x18x144xf32, #tpu.memory_space<vmem>>, vector<2x16x128xf32>
    %81 = arith.maximumf %79, %80 : vector<2x16x128xf32>
    %c0_103 = arith.constant 0 : index
    %c0_104 = arith.constant 0 : index
    %82 = vector.load %arg7[%c0_103, %c0_104] : memref<1x128xf32, #tpu.memory_space<vmem>>, vector<1x128xf32>
    %83 = vector.shape_cast %82 : vector<1x128xf32> to vector<128xf32>
    %84 = vector.shape_cast %83 : vector<128xf32> to vector<1x1x128xf32>
    %85 = vector.broadcast %84 : vector<1x1x128xf32> to vector<2x16x128xf32>
    %86 = arith.mulf %81, %85 : vector<2x16x128xf32>
    %c0_105 = arith.constant 0 : index
    %c0_106 = arith.constant 0 : index
    %87 = vector.load %arg8[%c0_105, %c0_106] : memref<1x128xf32, #tpu.memory_space<vmem>>, vector<1x128xf32>
    %88 = vector.shape_cast %87 : vector<1x128xf32> to vector<128xf32>
    %89 = vector.shape_cast %88 : vector<128xf32> to vector<1x1x128xf32>
    %90 = vector.broadcast %89 : vector<1x1x128xf32> to vector<2x16x128xf32>
    %91 = arith.addf %86, %90 : vector<2x16x128xf32>
    %92 = vector.shape_cast %64 : vector<32x128xf32> to vector<2x16x128xf32>
    %93 = arith.addf %92, %91 : vector<2x16x128xf32>
    %c0_107 = arith.constant 0 : index
    %c0_108 = arith.constant 0 : index
    %c0_109 = arith.constant 0 : index
    %94 = vector.load %arg9[%c0_107, %c0_108, %c0_109] : memref<2x16x128xf32, #tpu.memory_space<vmem>>, vector<2x16x128xf32>
    tpu.vector_store %arg9[%c0_107, %c0_108, %c0_109], %93 {strides = array<i32>} : memref<2x16x128xf32, #tpu.memory_space<vmem>>, vector<2x16x128xf32>,
    return
  }
  func.func @transform_0(%arg0: i32) -> (i32, i32, i32) {
    %c0_i32 = arith.constant 0 : i32
    %c0_i32_0 = arith.constant 0 : i32
    %c0_i32_1 = arith.constant 0 : i32
    return %arg0, %c0_i32, %c0_i32_0 : i32, i32, i32
  }
  func.func @transform_1(%arg0: i32) -> (i32, i32, i32) {
    %c0_i32 = arith.constant 0 : i32
    %c0_i32_0 = arith.constant 0 : i32
    %c0_i32_1 = arith.constant 0 : i32
    return %arg0, %c0_i32, %c0_i32_0 : i32, i32, i32
  }
  func.func @transform_2(%arg0: i32) -> (i32, i32, i32) {
    %c0_i32 = arith.constant 0 : i32
    %c0_i32_0 = arith.constant 0 : i32
    %c0_i32_1 = arith.constant 0 : i32
    %c0_i32_2 = arith.constant 0 : i32
    return %c0_i32, %c0_i32_0, %c0_i32_1 : i32, i32, i32
  }
  func.func @transform_3(%arg0: i32) -> (i32, i32) {
    %c0_i32 = arith.constant 0 : i32
    %c0_i32_0 = arith.constant 0 : i32
    %c0_i32_1 = arith.constant 0 : i32
    return %c0_i32, %c0_i32_0 : i32, i32
  }
  func.func @transform_4(%arg0: i32) -> (i32, i32, i32) {
    %c0_i32 = arith.constant 0 : i32
    %c0_i32_0 = arith.constant 0 : i32
    %c0_i32_1 = arith.constant 0 : i32
    %c0_i32_2 = arith.constant 0 : i32
    return %c0_i32, %c0_i32_0, %c0_i32_1 : i32, i32, i32
  }
  func.func @transform_5(%arg0: i32) -> (i32, i32) {
    %c0_i32 = arith.constant 0 : i32
    %c0_i32_0 = arith.constant 0 : i32
    %c0_i32_1 = arith.constant 0 : i32
    return %c0_i32, %c0_i32_0 : i32, i32
  }
  func.func @transform_6(%arg0: i32) -> (i32, i32) {
    %c0_i32 = arith.constant 0 : i32
    %c0_i32_0 = arith.constant 0 : i32
    %c0_i32_1 = arith.constant 0 : i32
    return %c0_i32, %c0_i32_0 : i32, i32
  }
  func.func @transform_7(%arg0: i32) -> (i32, i32) {
    %c0_i32 = arith.constant 0 : i32
    %c0_i32_0 = arith.constant 0 : i32
    %c0_i32_1 = arith.constant 0 : i32
    return %c0_i32, %c0_i32_0 : i32, i32
  }
  func.func @transform_8(%arg0: i32) -> (i32, i32, i32) {
    %c0_i32 = arith.constant 0 : i32
    %c0_i32_0 = arith.constant 0 : i32
    %c0_i32_1 = arith.constant 0 : i32
    return %arg0, %c0_i32, %c0_i32_0 : i32, i32, i32
  }
}

</mosaic_0001>

<bundles_post_ra>
// kernel: tile.23
= control target key start
LH: loop header
LB: loop body
LE: loop exit
PB: predicated region body
PF: predicated region fallthrough
CT: control target
= control target key end

     0   :  { %s28_s0 = inlined_call_operand.vmem [shape: f32[8], index: 0, kind: input, shape index: {}]   ;;  %s29_s1 = inlined_call_operand.vmem [shape: f32[16,8], index: 1, kind: output, shape index: {}]  }
   0x1   :  { %v4_v0 = vld [vmem:[%s28_s0] ss:$0 sm:$0xff] }
   0x2   :  { %5 = vst [vmem:[%s29_s1] sm:$0xff] %v4_v0  ;;  %8 = vst [vmem:[%s29_s1 + $0x8] sm:$0xff] %v4_v0 }

// kernel: tile.24
= control target key start
LH: loop header
LB: loop body
LE: loop exit
PB: predicated region body
PF: predicated region fallthrough
CT: control target
= control target key end

     0   :  { %s133_s10 = smov 120   ;;  %s134_s11 = smov 104   ;;  %vm3_vm0 = vcmask 64512   ;;  %vm9_vm1 = vcmask 1048512   ;;  %vm15_vm2 = vcmask 982912   ;;  %vm21_vm3 = vcmask 917312   ;;  %s209_s0 = inlined_call_operand.vmem [shape: f32[16,8], index: 0, kind: input, shape index: {}]   ;;  %s210_s1 = inlined_call_operand.vmem [shape: f32[1,128], index: 1, kind: output, shape index: {}]  }
   0x1   :  { %v103_v0 = vld [vmem:[%s209_s0 + $0xf] sm:$0x1]   ;;  %v105_v1 = vld [vmem:[%s209_s0 + $0xd] sm:$0x1]   ;;  %v104_v2 = vld [vmem:[%s209_s0 + $0xe] sm:$0x1]  }
   0x2   :  { %7 = vrot.lane.b32.xlu0 %v103_v0, %s133_s10  ;;  %19 = vrot.lane.b32.xlu1 %v105_v1, %s134_s11  ;;  %v106_v3 = vld [vmem:[%s209_s0 + $0xc] sm:$0x1]   ;;  %s135_s16 = smov 112   ;;  %s136_s17 = smov 96   ;;  %v107_v4 = vld [vmem:[%s209_s0 + $0xb] sm:$0x1]  }
   0x3   :  { %v108_v5 = vld [vmem:[%s209_s0 + $0xa] sm:$0x1]   ;;  %v2_v6 = vld [vmem:[%s209_s0] sm:$0x1]   ;;  %s137_s24 = smov 88   ;;  %s138_s25 = smov 80  }
   0x4   :  { %4 = vst.msk [vmem:[#allocation0] sm:$0x1] %vm3_vm0, %v2_v6   ;;  %v109_v7 = vld [vmem:[%s209_s0 + $0x9] sm:$0x1]   ;;  %v110_v8 = vld [vmem:[%s209_s0 + $0x8] sm:$0x1]  }
   0x5   :  { %s139_s30 = smov 72   ;;  %s140_s2 = smov 64   ;;  %v111_v9 = vld [vmem:[%s209_s0 + $0x7] sm:$0x1]   ;;  %v112_v10 = vld [vmem:[%s209_s0 + $0x6] sm:$0x1]  }
   0x6   :  { %13 = vrot.lane.b32.xlu0 %v104_v2, %s135_s16  ;;  %25 = vrot.lane.b32.xlu1 %v106_v3, %s136_s17  ;;  %s141_s7 = smov 56   ;;  %s142_s8 = smov 48   ;;  %v113_v11 = vld [vmem:[%s209_s0 + $0x5] sm:$0x1]   ;;  %v114_v12 = vld [vmem:[%s209_s0 + $0x4] sm:$0x1]  }
   0x7   :  { %s143_s13 = smov 40   ;;  %s144_s14 = smov 32   ;;  %v115_v13 = vld [vmem:[%s209_s0 + $0x3] sm:$0x1]   ;;  %v116_v14 = vld [vmem:[%s209_s0 + $0x2] sm:$0x1]  }
   0x8   :  { %s145_s19 = smov 24   ;;  %s146_s20 = smov 16   ;;  %v117_v15 = vld [vmem:[%s209_s0 + $0x1] sm:$0x1]   ;;  %vm27_vm4 = vcmask 851712   ;;  %vm33_vm5 = vcmask 786112  }
   0x9   :  { %s147_s0 = smov 8   ;;  %vm39_vm6 = vcmask 720512   ;;  %vm45_vm7 = vcmask 654912   ;;  %vm51_vm8 = vcmask 589312   ;;  %vm57_vm9 = vcmask 523712  }
   0xa   :  { %31 = vrot.lane.b32.xlu0 %v107_v4, %s137_s24  ;;  %37 = vrot.lane.b32.xlu1 %v108_v5, %s138_s25  ;;  %vm63_vm10 = vcmask 458112   ;;  %vm69_vm11 = vcmask 392512   ;;  %vm75_vm12 = vcmask 326912   ;;  %vm81_vm13 = vcmask 261312  }
   0xb   :  { %vm87_vm14 = vcmask 195712   ;;  %vm93_vm15 = vcmask 130112  }
   0xe   :  { %43 = vrot.lane.b32.xlu0 %v109_v7, %s139_s30  ;;  %49 = vrot.lane.b32.xlu1 %v110_v8, %s140_s2 }
  0x12   :  { %55 = vrot.lane.b32.xlu0 %v111_v9, %s141_s7  ;;  %61 = vrot.lane.b32.xlu1 %v112_v10, %s142_s8 }
  0x16   :  { %67 = vrot.lane.b32.xlu0 %v113_v11, %s143_s13  ;;  %73 = vrot.lane.b32.xlu1 %v114_v12, %s144_s14 }
  0x1a   :  { %79 = vrot.lane.b32.xlu0 %v115_v13, %s145_s19  ;;  %85 = vrot.lane.b32.xlu1 %v116_v14, %s146_s20 }
  0x1e   :  { %91 = vrot.lane.b32.xlu0 %v117_v15, %s147_s0 }
  0x74   :  { %v8_v16 = vpop.permute.xlu0 %7   ;;  %v20_v17 = vpop.permute.xlu1 %19  }
  0x75   :  { %10 = vst.msk [vmem:[#allocation0] sm:$0x1] %vm9_vm1, %v8_v16  }
  0x78   :  { %v14_v18 = vpop.permute.xlu0 %13   ;;  %v26_v19 = vpop.permute.xlu1 %25  }
  0x79   :  { %16 = vst.msk [vmem:[#allocation0] sm:$0x1] %vm15_vm2, %v14_v18  }
  0x7a   :  { %22 = vst.msk [vmem:[#allocation0] sm:$0x1] %vm21_vm3, %v20_v17  }
  0x7b   :  { %28 = vst.msk [vmem:[#allocation0] sm:$0x1] %vm27_vm4, %v26_v19  }
  0x7c   :  { %v32_v20 = vpop.permute.xlu0 %31   ;;  %v38_v21 = vpop.permute.xlu1 %37  }
  0x7d   :  { %34 = vst.msk [vmem:[#allocation0] sm:$0x1] %vm33_vm5, %v32_v20  }
  0x7e   :  { %40 = vst.msk [vmem:[#allocation0] sm:$0x1] %vm39_vm6, %v38_v21  }
  0x80   :  { %v44_v22 = vpop.permute.xlu0 %43   ;;  %v50_v23 = vpop.permute.xlu1 %49  }
  0x81   :  { %46 = vst.msk [vmem:[#allocation0] sm:$0x1] %vm45_vm7, %v44_v22  }
  0x82   :  { %52 = vst.msk [vmem:[#allocation0] sm:$0x1] %vm51_vm8, %v50_v23  }
  0x84   :  { %v56_v24 = vpop.permute.xlu0 %55   ;;  %v62_v25 = vpop.permute.xlu1 %61  }
  0x85   :  { %58 = vst.msk [vmem:[#allocation0] sm:$0x1] %vm57_vm9, %v56_v24  }
  0x86   :  { %64 = vst.msk [vmem:[#allocation0] sm:$0x1] %vm63_vm10, %v62_v25  }
  0x88   :  { %v68_v26 = vpop.permute.xlu0 %67   ;;  %v74_v27 = vpop.permute.xlu1 %73  }
  0x89   :  { %70 = vst.msk [vmem:[#allocation0] sm:$0x1] %vm69_vm11, %v68_v26  }
  0x8a   :  { %76 = vst.msk [vmem:[#allocation0] sm:$0x1] %vm75_vm12, %v74_v27  }
  0x8c   :  { %v80_v28 = vpop.permute.xlu0 %79   ;;  %v86_v29 = vpop.permute.xlu1 %85  }
  0x8d   :  { %82 = vst.msk [vmem:[#allocation0] sm:$0x1] %vm81_vm13, %v80_v28  }
  0x8e   :  { %88 = vst.msk [vmem:[#allocation0] sm:$0x1] %vm87_vm14, %v86_v29  }
  0x90   :  { %v92_v30 = vpop.permute.xlu0 %91  }
  0x91   :  { %94 = vst.msk [vmem:[#allocation0] sm:$0x1] %vm93_vm15, %v92_v30  }
  0x98   :  { %v99_v31 = vld [vmem:[#allocation0] sm:$0x1] }
  0x99   :  { %102 = vst [vmem:[%s210_s1] sm:$0x1] %v99_v31 }

// kernel: node_forward_nhwc.1
= control target key start
LH: loop header
LB: loop body
LE: loop exit
PB: predicated region body
PF: predicated region fallthrough
CT: control target
= control target key end

     0   :  { %vm48_vm0 = vcmask 64513   ;;  %v1710_v3 = vmov 0.0   ;;  %v1711_v4 = vmov -3e+38   ;;  %vm57_vm1 = vcmask 130113   ;;  %s1712_s25 = smov 8   ;;  %s2545_s2 = inlined_call_operand.vmem [shape: f32[3,128,128], index: 2, kind: input, shape index: {}]   ;;  %s2546_s1 = inlined_call_operand.vmem [shape: f32[2,16,128], index: 1, kind: input, shape index: {}]   ;;  %s2547_s0 = inlined_call_operand.vmem [shape: f32[2,16,128], index: 0, kind: input, shape index: {}]   ;;  %s2548_s4 = inlined_call_operand.vmem [shape: f32[3,128,128], index: 4, kind: input, shape index: {}]   ;;  %s2549_s6 = inlined_call_operand.vmem [shape: f32[1,128], index: 6, kind: input, shape index: {}]   ;;  %s2550_s7 = inlined_call_operand.vmem [shape: f32[1,128], index: 7, kind: input, shape index: {}]   ;;  %s2551_s3 = inlined_call_operand.vmem [shape: f32[1,128], index: 3, kind: input, shape index: {}]   ;;  %s2552_s5 = inlined_call_operand.vmem [shape: f32[1,128], index: 5, kind: input, shape index: {}]   ;;  %s2553_s8 = inlined_call_operand.vmem [shape: f32[2,16,128], index: 8, kind: output, shape index: {}]  }
   0x1   :  { %v1305_v0 = vld [vmem:[%s2545_s2 + $0xf8] sm:$0xff]  ;;  %v1304_v2 = vld [vmem:[%s2545_s2 + $0xf0] sm:$0xff]  ;;  %29 = vst [vmem:[#allocation2] sm:$0x1] %v1710_v3  ;;  %30 = vst [vmem:[#allocation2 + $0x18] sm:$0x1] %v1710_v3  ;;  %v33_v18 = vlaneseq }
   0x2   :  { %v145_v1 = vld [vmem:[%s2545_s2 + $0x78] sm:$0xff]  ;;  %31 = vst [vmem:[#allocation2 + $0x11] sm:$0x1] %v1710_v3  ;;  %32 = vst [vmem:[#allocation2 + $0x29] sm:$0x1] %v1710_v3  ;;  %vm50_vm2 = vcmask 64512   ;;  %1478 = vmatprep.subr.mxu0 %v1305_v0 }
   0x3   :  { %54 = vst.msk [vmem:[#allocation3 + $0x30] sm:$0xfe] %vm48_vm0, %v1711_v4  ;;  %49 = vst.msk [vmem:[#allocation3] sm:$0xfe] %vm48_vm0, %v1711_v4  ;;  %1516 = vmatprep.subr.mxu1 %v145_v1  ;;  %v144_v5 = vld [vmem:[%s2545_s2 + $0x70] sm:$0xff]  ;;  %v66_v7 = vld [vmem:[%s2546_s1] sm:$0xff]  ;;  %1479 = vmatpush3.msra.mxu0 %v1305_v0 }
   0x4   :  { %v68_v6 = vld [vmem:[%s2546_s1 + $0x10] sm:$0xff]  ;;  %63 = vst.msk [vmem:[#allocation3 + $0x38] sm:$0xfe] %vm57_vm1, %v1711_v4  ;;  %58 = vst.msk [vmem:[#allocation3 + $0x8] sm:$0xfe] %vm57_vm1, %v1711_v4  ;;  %vm59_vm3 = vcmask 130112   ;;  %1517 = vmatpush3.msra.mxu1 %v145_v1  ;;  %1480 = vmatprep.subr.mxu0 %v1304_v2 }
   0x5   :  { %55 = vst.msk [vmem:[#allocation3 + $0x40] sm:$0xff] %vm50_vm2, %v1711_v4  ;;  %51 = vst.msk [vmem:[#allocation3 + $0x10] sm:$0xff] %vm50_vm2, %v1711_v4  ;;  %vm52_vm4 = vcmask 57344   ;;  %v78_v8 = vrot.slane %v68_v6, 7  ;;  %v75_v9 = vrot.slane %v66_v7, 7  ;;  %v1303_v10 = vld [vmem:[%s2545_s2 + $0xe8] sm:$0xff]  ;;  %1518 = vmatprep.subr.mxu1 %v144_v5  ;;  %1481 = vmatpush3.msra.mxu0 %v1304_v2 }
   0x6   :  { %64 = vst.msk [vmem:[#allocation3 + $0x48] sm:$0xff] %vm59_vm3, %v1711_v4  ;;  %60 = vst.msk [vmem:[#allocation3 + $0x18] sm:$0xff] %vm59_vm3, %v1711_v4  ;;  %vm61_vm5 = vcmask 122944   ;;  %v143_v11 = vld [vmem:[%s2545_s2 + $0x68] sm:$0xff]  ;;  %v69_v12 = vld [vmem:[%s2546_s1 + $0x18] sm:$0xff]  ;;  %vm74_vm6 = vcmask 1040384   ;;  %1519 = vmatpush3.msra.mxu1 %v144_v5  ;;  %1482 = vmatprep.subr.mxu0 %v1303_v10 }
   0x7   :  { %56 = vst.msk [vmem:[#allocation3 + $0x50] sm:$0x1] %vm52_vm4, %v1711_v4  ;;  %53 = vst.msk [vmem:[#allocation3 + $0x20] sm:$0x1] %vm52_vm4, %v1711_v4  ;;  %v67_v13 = vld [vmem:[%s2546_s1 + $0x8] sm:$0xff]  ;;  %87 = vrot.lane.b32.xlu1 %v78_v8, %s1712_s25  ;;  %81 = vrot.lane.b32.xlu0 %v75_v9, %s1712_s25  ;;  %v79_v14 = vrot.slane %v69_v12, 7 }
   0x8   :  { %65 = vst.msk [vmem:[#allocation3 + $0x58] sm:$0x1] %vm61_vm5, %v1711_v4  ;;  %62 = vst.msk [vmem:[#allocation3 + $0x28] sm:$0x1] %vm61_vm5, %v1711_v4  ;;  %v76_v15 = vrot.slane %v67_v13, 7  ;;  %v1302_v16 = vld [vmem:[%s2545_s2 + $0xe0] sm:$0xff]  ;;  %1520 = vmatprep.subr.mxu1 %v143_v11  ;;  %1483 = vmatpush3.msra.mxu0 %v1303_v10 }
   0x9   :  { %v142_v17 = vld [vmem:[%s2545_s2 + $0x60] sm:$0xff]  ;;  %v80_v19 = vsel %vm74_vm6, %v78_v8, %v79_v14  ;;  %1521 = vmatpush3.msra.mxu1 %v143_v11  ;;  %vm35_vm7 = vcmp.lt.s32.totalorder %v33_v18, 144  ;;  %1484 = vmatprep.subr.mxu0 %v1302_v16  ;;  %v1301_v21 = vld [vmem:[%s2545_s2 + $0xd8] sm:$0xff]  ;;  %v1300_v23 = vld [vmem:[%s2545_s2 + $0xd0] sm:$0xff]  ;;  %vm99_vm8 = vcmask 1047617   ;;  %vm102_vm9 = vcmask 1047616  }
   0xa   :  { %v77_v20 = vsel %vm74_vm6, %v75_v9, %v76_v15  ;;  %1522 = vmatprep.subr.mxu1 %v142_v17  ;;  %v141_v22 = vld [vmem:[%s2545_s2 + $0x58] sm:$0xff]  ;;  %40 = vst.msk [vmem:[#allocation3 + $0x30] ss:$8 sm:$0x3] %vm35_vm7, %v1711_v4  ;;  %1485 = vmatpush3.msra.mxu0 %v1302_v16  ;;  %v140_v24 = vld [vmem:[%s2545_s2 + $0x50] sm:$0xff]  ;;  %v1822_v25 = vld [vmem:[%s2547_s0] sm:$0xff] }
   0xb   :  { %37 = vst.msk [vmem:[#allocation3] ss:$8 sm:$0x3] %vm35_vm7, %v1711_v4  ;;  %43 = vst.msk [vmem:[#allocation3 + $0x21] ss:$8 sm:$0x3] %vm35_vm7, %v1711_v4  ;;  %89 = vrot.lane.b32.xlu1 %v80_v19, %s1712_s25  ;;  %83 = vrot.lane.b32.xlu0 %v77_v20, %s1712_s25 }
   0xc   :  { %46 = vst.msk [vmem:[#allocation3 + $0x51] ss:$8 sm:$0x3] %vm35_vm7, %v1711_v4  ;;  %1523 = vmatpush3.msra.mxu1 %v142_v17  ;;  %1486 = vmatprep.subr.mxu0 %v1301_v21  ;;  %v1299_v26 = vld [vmem:[%s2545_s2 + $0xc8] sm:$0xff]  ;;  %v118_v28 = vmax.f32 %v1822_v25, 0.0  ;;  %v1298_v31 = vld [vmem:[%s2545_s2 + $0xc0] sm:$0xff] }
   0xd   :  { %1524 = vmatprep.subr.mxu1 %v141_v22  ;;  %1487 = vmatpush3.msra.mxu0 %v1301_v21  ;;  %v139_v27 = vld [vmem:[%s2545_s2 + $0x48] sm:$0xff]  ;;  %v138_v32 = vld [vmem:[%s2545_s2 + $0x40] sm:$0xff]  ;;  %v1297_v33 = vld [vmem:[%s2545_s2 + $0xb8] sm:$0xff]  ;;  %vm105_vm10 = vcmask 1040448   ;;  %s1713_s24 = smov 120   ;;  %vm1043_vm11 = vcmask 1046528  }
   0xe   :  { %1525 = vmatpush3.msra.mxu1 %v141_v22  ;;  %1488 = vmatprep.subr.mxu0 %v1300_v23  ;;  %v1834_v29 = vld [vmem:[%s2547_s0 + $0x8] sm:$0xff]  ;;  %122 = vst [vmem:[#allocation2 + $0x1] sm:$0xff] %v118_v28  ;;  %v137_v34 = vld [vmem:[%s2545_s2 + $0x38] sm:$0xff]  ;;  %v1858_v35 = vld [vmem:[%s2547_s0 + $0x10] sm:$0xff]  ;;  %vm912_vm12 = vcmask 982016  }
   0xf   :  { %1526 = vmatprep.subr.mxu1 %v140_v24  ;;  %91 = vrot.lane.b32.xlu1 %v79_v14, %s1712_s25  ;;  %v119_v30 = vmax.f32 %v1834_v29, 0.0  ;;  %v1863_v36 = vld [vmem:[%s2547_s0 + $0x18] sm:$0xff]  ;;  %v1296_v37 = vld [vmem:[%s2545_s2 + $0xb0] sm:$0xff]  ;;  %v120_v39 = vmax.f32 %v1858_v35, 0.0  ;;  %v1295_v41 = vld [vmem:[%s2545_s2 + $0xa8] sm:$0xff] }
  0x10   :  { %85 = vrot.lane.b32.xlu0 %v76_v15, %s1712_s25  ;;  %1489 = vmatpush3.msra.mxu0 %v1300_v23  ;;  %v136_v38 = vld [vmem:[%s2545_s2 + $0x30] sm:$0xff]  ;;  %v121_v40 = vmax.f32 %v1863_v36, 0.0  ;;  %v135_v42 = vld [vmem:[%s2545_s2 + $0x28] sm:$0xff]  ;;  %v1294_v43 = vld [vmem:[%s2545_s2 + $0xa0] sm:$0xff] }
  0x11   :  { %1527 = vmatpush3.msra.mxu1 %v140_v24  ;;  %1490 = vmatprep.subr.mxu0 %v1299_v26  ;;  %123 = vst [vmem:[#allocation2 + $0x9] sm:$0xff] %v119_v30  ;;  %124 = vst [vmem:[#allocation2 + $0x19] sm:$0xff] %v120_v39  ;;  %v134_v44 = vld [vmem:[%s2545_s2 + $0x20] sm:$0xff]  ;;  %v1293_v45 = vld [vmem:[%s2545_s2 + $0x98] sm:$0xff] }
  0x12   :  { %1528 = vmatprep.subr.mxu1 %v139_v27  ;;  %1491 = vmatpush3.msra.mxu0 %v1299_v26  ;;  %125 = vst [vmem:[#allocation2 + $0x21] sm:$0xff] %v121_v40  ;;  %v133_v46 = vld [vmem:[%s2545_s2 + $0x18] sm:$0xff]  ;;  %v1292_v47 = vld [vmem:[%s2545_s2 + $0x90] sm:$0xff]  ;;  %v1291_v49 = vld [vmem:[%s2545_s2 + $0x88] sm:$0xff] }
  0x13   :  { %1529 = vmatpush3.msra.mxu1 %v139_v27  ;;  %1492 = vmatprep.subr.mxu0 %v1298_v31  ;;  %v132_v48 = vld [vmem:[%s2545_s2 + $0x10] sm:$0xff]  ;;  %v131_v50 = vld [vmem:[%s2545_s2 + $0x8] sm:$0xff]  ;;  %v1290_v51 = vld [vmem:[%s2545_s2 + $0x80] sm:$0xff] }
  0x14   :  { %1530 = vmatprep.subr.mxu1 %v138_v32  ;;  %1493 = vmatpush3.msra.mxu0 %v1298_v31  ;;  %v130_v52 = vld [vmem:[%s2545_s2] sm:$0xff]  ;;  %v1321_v55 = vld [vmem:[%s2545_s2 + $0x178] sm:$0xff]  ;;  %v1320_v57 = vld [vmem:[%s2545_s2 + $0x170] sm:$0xff] }
  0x15   :  { %1531 = vmatpush3.msra.mxu1 %v138_v32  ;;  %1494 = vmatprep.subr.mxu0 %v1297_v33  ;;  %v126_v53 = vld [vmem:[#allocation2] sm:$0xff]  ;;  %v1319_v59 = vld [vmem:[%s2545_s2 + $0x168] sm:$0xff]  ;;  %v1317_v62 = vld [vmem:[%s2545_s2 + $0x158] sm:$0xff] }
  0x16   :  { %1532 = vmatprep.subr.mxu1 %v137_v34  ;;  %1495 = vmatpush3.msra.mxu0 %v1297_v33  ;;  %v1318_v61 = vld [vmem:[%s2545_s2 + $0x160] sm:$0xff]  ;;  %v1316_v63 = vld [vmem:[%s2545_s2 + $0x150] sm:$0xff]  ;;  %v1315_v0 = vld [vmem:[%s2545_s2 + $0x148] sm:$0xff] }
  0x17   :  { %1533 = vmatpush3.msra.mxu1 %v137_v34  ;;  %1496 = vmatprep.subr.mxu0 %v1296_v37  ;;  %v1314_v1 = vld [vmem:[%s2545_s2 + $0x140] sm:$0xff]  ;;  %v1313_v2 = vld [vmem:[%s2545_s2 + $0x138] sm:$0xff]  ;;  %v1312_v3 = vld [vmem:[%s2545_s2 + $0x130] sm:$0xff] }
  0x18   :  { %1534 = vmatprep.subr.mxu1 %v136_v38  ;;  %1497 = vmatpush3.msra.mxu0 %v1296_v37  ;;  %v127_v54 = vld [vmem:[#allocation2 + $0x8] sm:$0xff]  ;;  %v128_v56 = vld [vmem:[#allocation2 + $0x18] sm:$0xff]  ;;  %v1310_v5 = vld [vmem:[%s2545_s2 + $0x120] sm:$0xff] }
  0x19   :  { %1535 = vmatpush3.msra.mxu1 %v136_v38  ;;  %1498 = vmatprep.subr.mxu0 %v1295_v41  ;;  %v129_v58 = vld [vmem:[#allocation2 + $0x20] sm:$0xff]  ;;  %v1311_v4 = vld [vmem:[%s2545_s2 + $0x128] sm:$0xff]  ;;  %v1309_v6 = vld [vmem:[%s2545_s2 + $0x118] sm:$0xff] }
  0x1a   :  { %1536 = vmatprep.subr.mxu1 %v135_v42  ;;  %1499 = vmatpush3.msra.mxu0 %v1295_v41  ;;  %v337_v60 = vld [vmem:[#allocation2 + $0x2] sm:$0xff]  ;;  %v1308_v7 = vld [vmem:[%s2545_s2 + $0x110] sm:$0xff]  ;;  %v339_v11 = vld [vmem:[#allocation2 + $0x1a] sm:$0xff] }
  0x1b   :  { %1537 = vmatpush3.msra.mxu1 %v135_v42  ;;  %1500 = vmatprep.subr.mxu0 %v1294_v43  ;;  %v1307_v8 = vld [vmem:[%s2545_s2 + $0x108] sm:$0xff]  ;;  %v1306_v9 = vld [vmem:[%s2545_s2 + $0x100] sm:$0xff]  ;;  %v1338_v13 = vld [vmem:[%s2548_s4 + $0xf8] sm:$0xff] }
  0x1c   :  { %1538 = vmatprep.subr.mxu1 %v134_v44  ;;  %1501 = vmatpush3.msra.mxu0 %v1294_v43  ;;  %v338_v10 = vld [vmem:[#allocation2 + $0xa] sm:$0xff]  ;;  %v340_v12 = vld [vmem:[#allocation2 + $0x22] sm:$0xff]  ;;  %v485_v15 = vld [vmem:[%s2548_s4 + $0x78] sm:$0xff] }
  0x1d   :  { %1539 = vmatpush3.msra.mxu1 %v134_v44  ;;  %1502 = vmatprep.subr.mxu0 %v1293_v45  ;;  %v1337_v14 = vld [vmem:[%s2548_s4 + $0xf0] sm:$0xff]  ;;  %v1336_v17 = vld [vmem:[%s2548_s4 + $0xe8] sm:$0xff]  ;;  %v1335_v19 = vld [vmem:[%s2548_s4 + $0xe0] sm:$0xff] }
  0x1e   :  { %1540 = vmatprep.subr.mxu1 %v133_v46  ;;  %1503 = vmatpush3.msra.mxu0 %v1293_v45  ;;  %v484_v16 = vld [vmem:[%s2548_s4 + $0x70] sm:$0xff]  ;;  %v483_v18 = vld [vmem:[%s2548_s4 + $0x68] sm:$0xff]  ;;  %v1334_v22 = vld [vmem:[%s2548_s4 + $0xd8] sm:$0xff] }
  0x1f   :  { %1541 = vmatpush3.msra.mxu1 %v133_v46  ;;  %1504 = vmatprep.subr.mxu0 %v1292_v47  ;;  %v1333_v23 = vld [vmem:[%s2548_s4 + $0xd0] sm:$0xff]  ;;  %v1332_v24 = vld [vmem:[%s2548_s4 + $0xc8] sm:$0xff]  ;;  %v482_v27 = vld [vmem:[%s2548_s4 + $0x60] sm:$0xff] }
  0x20   :  { %1542 = vmatprep.subr.mxu1 %v132_v48  ;;  %1505 = vmatpush3.msra.mxu0 %v1292_v47  ;;  %v1331_v29 = vld [vmem:[%s2548_s4 + $0xc0] sm:$0xff]  ;;  %v480_v34 = vld [vmem:[%s2548_s4 + $0x50] sm:$0xff]  ;;  %v479_v35 = vld [vmem:[%s2548_s4 + $0x48] sm:$0xff] }
  0x21   :  { %1543 = vmatpush3.msra.mxu1 %v132_v48  ;;  %1506 = vmatprep.subr.mxu0 %v1291_v49  ;;  %v1330_v36 = vld [vmem:[%s2548_s4 + $0xb8] sm:$0xff]  ;;  %v478_v37 = vld [vmem:[%s2548_s4 + $0x40] sm:$0xff]  ;;  %v1328_v42 = vld [vmem:[%s2548_s4 + $0xa8] sm:$0xff] }
  0x22   :  { %1544 = vmatprep.subr.mxu1 %v131_v50  ;;  %1507 = vmatpush3.msra.mxu0 %v1291_v49  ;;  %v477_v38 = vld [vmem:[%s2548_s4 + $0x38] sm:$0xff]  ;;  %v476_v44 = vld [vmem:[%s2548_s4 + $0x30] sm:$0xff]  ;;  %v475_v45 = vld [vmem:[%s2548_s4 + $0x28] sm:$0xff] }
  0x23   :  { %1545 = vmatpush3.msra.mxu1 %v131_v50  ;;  %1508 = vmatprep.subr.mxu0 %v1290_v51  ;;  %v1327_v46 = vld [vmem:[%s2548_s4 + $0xa0] sm:$0xff]  ;;  %v1326_v49 = vld [vmem:[%s2548_s4 + $0x98] sm:$0xff] }
  0x24   :  { %1546 = vmatprep.subr.mxu1 %v130_v52  ;;  %1509 = vmatpush3.msra.mxu0 %v1290_v51  ;;  %v474_v48 = vld [vmem:[%s2548_s4 + $0x20] sm:$0xff]  ;;  %v473_v50 = vld [vmem:[%s2548_s4 + $0x18] sm:$0xff]  ;;  %v1325_v51 = vld [vmem:[%s2548_s4 + $0x90] sm:$0xff] }
  0x25   :  { %1510 = vmatprep.mubr.f32.mxu0 %v118_v28  ;;  %1547 = vmatpush3.msra.mxu1 %v130_v52  ;;  %v481_v28 = vld [vmem:[%s2548_s4 + $0x58] sm:$0xff] }
  0x26   :  { %1548 = vmatprep.mubr.f32.mxu1 %v126_v53  ;;  %1511 = vmatmul.mubr.f32.vlgmr.msra.gmra.mxu0 %v119_v30  ;;  %v472_v53 = vld [vmem:[%s2548_s4 + $0x10] sm:$0xff] }
  0x27   :  { %1549 = vmatmul.mubr.f32.vlgmr.msra.gmra.mxu1 %v127_v54  ;;  %1554 = vmatprep.subr.mxu0 %v1321_v55  ;;  %v1324_v54 = vld [vmem:[%s2548_s4 + $0x88] sm:$0xff] }
  0x28   :  { %1513 = vmatprep.mubr.f32.mxu0 %v120_v39  ;;  %1555 = vmatpush3.msra.mxu0 %v1321_v55  ;;  %v1329_v39 = vld [vmem:[%s2548_s4 + $0xb0] sm:$0xff] }
  0x29   :  { %1551 = vmatprep.mubr.f32.mxu1 %v128_v56  ;;  %1556 = vmatprep.subr.mxu0 %v1320_v57  ;;  %v471_v56 = vld [vmem:[%s2548_s4 + $0x8] sm:$0xff] }
  0x2a   :  { %1557 = vmatpush3.msra.mxu0 %v1320_v57  ;;  %1592 = vmatprep.subr.mxu1 %v1338_v13  ;;  %v1323_v57 = vld [vmem:[%s2548_s4 + $0x80] sm:$0xff] }
  0x2b   :  { %1552 = vmatmul.mubr.f32.gmra.mxu1 %v129_v58  ;;  %1558 = vmatprep.subr.mxu0 %v1319_v59  ;;  %v470_v58 = vld [vmem:[%s2548_s4] sm:$0xff] }
  0x2c   :  { %1514 = vmatmul.mubr.f32.gmra.mxu0 %v121_v40  ;;  %1593 = vmatpush3.msra.mxu1 %v1338_v13 }
  0x2d   :  { %1559 = vmatpush3.msra.mxu0 %v1319_v59  ;;  %1586 = vmatprep.mubr.f32.mxu0 %v337_v60  ;;  %v2110_v59 = vld [vmem:[%s2548_s4 + $0x178] sm:$0xff] }
  0x2e   :  { %1560 = vmatprep.subr.mxu0 %v1318_v61  ;;  %1594 = vmatprep.subr.mxu1 %v1337_v14 }
  0x2f   :  { %1561 = vmatpush3.msra.mxu0 %v1318_v61  ;;  %1595 = vmatpush3.msra.mxu1 %v1337_v14 }
  0x30   :  { %1562 = vmatprep.subr.mxu0 %v1317_v62  ;;  %1596 = vmatprep.subr.mxu1 %v1336_v17 }
  0x31   :  { %1563 = vmatpush3.msra.mxu0 %v1317_v62  ;;  %1597 = vmatpush3.msra.mxu1 %v1336_v17 }
  0x32   :  { %1564 = vmatprep.subr.mxu0 %v1316_v63  ;;  %1598 = vmatprep.subr.mxu1 %v1335_v19 }
  0x33   :  { %1565 = vmatpush3.msra.mxu0 %v1316_v63  ;;  %1599 = vmatpush3.msra.mxu1 %v1335_v19 }
  0x34   :  { %1566 = vmatprep.subr.mxu0 %v1315_v0  ;;  %1600 = vmatprep.subr.mxu1 %v1334_v22 }
  0x35   :  { %1567 = vmatpush3.msra.mxu0 %v1315_v0  ;;  %1601 = vmatpush3.msra.mxu1 %v1334_v22 }
  0x36   :  { %1568 = vmatprep.subr.mxu0 %v1314_v1  ;;  %1602 = vmatprep.subr.mxu1 %v1333_v23 }
  0x37   :  { %1569 = vmatpush3.msra.mxu0 %v1314_v1  ;;  %1603 = vmatpush3.msra.mxu1 %v1333_v23 }
  0x38   :  { %1570 = vmatprep.subr.mxu0 %v1313_v2  ;;  %1604 = vmatprep.subr.mxu1 %v1332_v24 }
  0x39   :  { %1571 = vmatpush3.msra.mxu0 %v1313_v2  ;;  %1605 = vmatpush3.msra.mxu1 %v1332_v24 }
  0x3a   :  { %1572 = vmatprep.subr.mxu0 %v1312_v3  ;;  %1606 = vmatprep.subr.mxu1 %v1331_v29 }
  0x3b   :  { %1573 = vmatpush3.msra.mxu0 %v1312_v3  ;;  %1607 = vmatpush3.msra.mxu1 %v1331_v29 }
  0x3c   :  { %1574 = vmatprep.subr.mxu0 %v1311_v4  ;;  %1608 = vmatprep.subr.mxu1 %v1330_v36 }
  0x3d   :  { %1575 = vmatpush3.msra.mxu0 %v1311_v4  ;;  %1609 = vmatpush3.msra.mxu1 %v1330_v36 }
  0x3e   :  { %1576 = vmatprep.subr.mxu0 %v1310_v5  ;;  %1610 = vmatprep.subr.mxu1 %v1329_v39 }
  0x3f   :  { %1577 = vmatpush3.msra.mxu0 %v1310_v5  ;;  %1611 = vmatpush3.msra.mxu1 %v1329_v39 }
  0x40   :  { %1578 = vmatprep.subr.mxu0 %v1309_v6  ;;  %1612 = vmatprep.subr.mxu1 %v1328_v42 }
  0x41   :  { %1579 = vmatpush3.msra.mxu0 %v1309_v6  ;;  %1613 = vmatpush3.msra.mxu1 %v1328_v42 }
  0x42   :  { %1580 = vmatprep.subr.mxu0 %v1308_v7  ;;  %1614 = vmatprep.subr.mxu1 %v1327_v46 }
  0x43   :  { %1581 = vmatpush3.msra.mxu0 %v1308_v7  ;;  %1615 = vmatpush3.msra.mxu1 %v1327_v46 }
  0x44   :  { %1582 = vmatprep.subr.mxu0 %v1307_v8  ;;  %1616 = vmatprep.subr.mxu1 %v1326_v49 }
  0x45   :  { %1583 = vmatpush3.msra.mxu0 %v1307_v8  ;;  %1617 = vmatpush3.msra.mxu1 %v1326_v49 }
  0x46   :  { %1584 = vmatprep.subr.mxu0 %v1306_v9  ;;  %1618 = vmatprep.subr.mxu1 %v1325_v51 }
  0x47   :  { %1585 = vmatpush3.msra.mxu0 %v1306_v9  ;;  %1619 = vmatpush3.msra.mxu1 %v1325_v51  ;;  %v1357_v51 = vld [vmem:[%s2550_s7] ss:$0 sm:$0xff] }
  0x48   :  { %1587 = vmatmul.mubr.f32.vlgmr.msra.gmra.mxu0 %v338_v10  ;;  %1630 = vmatprep.subr.mxu0 %v485_v15 }
  0x49   :  { %1589 = vmatprep.mubr.f32.mxu0 %v339_v11  ;;  %1631 = vmatpush3.msra.mxu0 %v485_v15 }
  0x4a   :  { %1632 = vmatprep.subr.mxu0 %v484_v16  ;;  %1620 = vmatprep.subr.mxu1 %v1324_v54 }
  0x4b   :  { %1633 = vmatpush3.msra.mxu0 %v484_v16  ;;  %1621 = vmatpush3.msra.mxu1 %v1324_v54 }
  0x4c   :  { %1590 = vmatmul.mubr.f32.gmra.mxu0 %v340_v12  ;;  %1634 = vmatprep.subr.mxu0 %v483_v18 }
  0x4d   :  { %1635 = vmatpush3.msra.mxu0 %v483_v18  ;;  %1622 = vmatprep.subr.mxu1 %v1323_v57 }
  0x4e   :  { %1636 = vmatprep.subr.mxu0 %v482_v27  ;;  %1623 = vmatpush3.msra.mxu1 %v1323_v57 }
  0x4f   :  { %1637 = vmatpush3.msra.mxu0 %v482_v27  ;;  %1668 = vmatprep.subr.mxu1 %v2110_v59 }
  0x50   :  { %1638 = vmatprep.subr.mxu0 %v481_v28 }
  0x51   :  { %1639 = vmatpush3.msra.mxu0 %v481_v28 }
  0x52   :  { %1640 = vmatprep.subr.mxu0 %v480_v34 }
  0x53   :  { %1641 = vmatpush3.msra.mxu0 %v480_v34 }
  0x54   :  { %1642 = vmatprep.subr.mxu0 %v479_v35 }
  0x55   :  { %1643 = vmatpush3.msra.mxu0 %v479_v35 }
  0x56   :  { %1644 = vmatprep.subr.mxu0 %v478_v37 }
  0x57   :  { %1645 = vmatpush3.msra.mxu0 %v478_v37 }
  0x58   :  { %1646 = vmatprep.subr.mxu0 %v477_v38 }
  0x59   :  { %1647 = vmatpush3.msra.mxu0 %v477_v38 }
  0x5a   :  { %1648 = vmatprep.subr.mxu0 %v476_v44 }
  0x5b   :  { %1649 = vmatpush3.msra.mxu0 %v476_v44 }
  0x5c   :  { %1650 = vmatprep.subr.mxu0 %v475_v45 }
  0x5d   :  { %1651 = vmatpush3.msra.mxu0 %v475_v45 }
  0x5e   :  { %1652 = vmatprep.subr.mxu0 %v474_v48 }
  0x5f   :  { %1653 = vmatpush3.msra.mxu0 %v474_v48 }
  0x60   :  { %1654 = vmatprep.subr.mxu0 %v473_v50 }
  0x61   :  { %1655 = vmatpush3.msra.mxu0 %v473_v50  ;;  %v1356_v50 = vld [vmem:[%s2549_s6] ss:$0 sm:$0xff] }
  0x62   :  { %1656 = vmatprep.subr.mxu0 %v472_v53 }
  0x63   :  { %1657 = vmatpush3.msra.mxu0 %v472_v53 }
  0x64   :  { %1658 = vmatprep.subr.mxu0 %v471_v56 }
  0x65   :  { %1659 = vmatpush3.msra.mxu0 %v471_v56 }
  0x66   :  { %1660 = vmatprep.subr.mxu0 %v470_v58 }
  0x67   :  { %1661 = vmatpush3.msra.mxu0 %v470_v58 }
  0x79   :  { %v88_v20 = vpop.permute.xlu1 %87  ;;  %v82_v21 = vpop.permute.xlu0 %81 }
  0x7a   :  { %108 = vst.msk [vmem:[#allocation3 + $0x30] sm:$0xfe] %vm99_vm8, %v88_v20  ;;  %100 = vst.msk [vmem:[#allocation3] sm:$0xfe] %vm99_vm8, %v82_v21 }
  0x7b   :  { %109 = vst.msk [vmem:[#allocation3 + $0x38] sm:$0xfe] %vm48_vm0, %v88_v20  ;;  %101 = vst.msk [vmem:[#allocation3 + $0x8] sm:$0xfe] %vm48_vm0, %v82_v21 }
  0x7d   :  { %v90_v25 = vpop.permute.xlu1 %89  ;;  %v84_v26 = vpop.permute.xlu0 %83 }
  0x7e   :  { %110 = vst.msk [vmem:[#allocation3 + $0x40] sm:$0xff] %vm102_vm9, %v90_v25  ;;  %103 = vst.msk [vmem:[#allocation3 + $0x10] sm:$0xff] %vm102_vm9, %v84_v26 }
  0x7f   :  { %111 = vst.msk [vmem:[#allocation3 + $0x48] sm:$0xff] %vm50_vm2, %v90_v25  ;;  %104 = vst.msk [vmem:[#allocation3 + $0x18] sm:$0xff] %vm50_vm2, %v84_v26 }
  0x81   :  { %v2008_v30 = vld [vmem:[#allocation3 + $0x30] sm:$0xfe]  ;;  %v2010_v31 = vld [vmem:[#allocation3] sm:$0xfe]  ;;  %v92_v32 = vpop.permute.xlu1 %91 }
  0x82   :  { %953 = vrot.lane.b32.xlu1 %v2008_v30, %s1712_s25  ;;  %947 = vrot.lane.b32.xlu0 %v2010_v31, %s1712_s25  ;;  %v86_v33 = vpop.permute.xlu0 %85  ;;  %112 = vst.msk [vmem:[#allocation3 + $0x50] sm:$0x1] %vm105_vm10, %v92_v32  ;;  %v2047_v43 = vld [vmem:[#allocation3 + $0x8] sm:$0xfe]  ;;  %v2080_v52 = vld [vmem:[#allocation3 + $0x38] sm:$0xfe] }
  0x83   :  { %113 = vst.msk [vmem:[#allocation3 + $0x58] sm:$0x1] %vm52_vm4, %v92_v32  ;;  %107 = vst.msk [vmem:[#allocation3 + $0x28] sm:$0x1] %vm52_vm4, %v86_v33  ;;  %v811_v0 = vld [vmem:[#allocation3 + $0x30] sm:$0xff]  ;;  %v810_v1 = vld [vmem:[#allocation3] sm:$0xff] }
  0x84   :  { %106 = vst.msk [vmem:[#allocation3 + $0x20] sm:$0x1] %vm105_vm10, %v86_v33  ;;  %v2133_v2 = vrot.slane %v811_v0, 7  ;;  %v2135_v3 = vrot.slane %v810_v1, 7  ;;  %v852_v4 = vld [vmem:[#allocation3 + $0x8] sm:$0xff]  ;;  %v853_v6 = vld [vmem:[#allocation3 + $0x38] sm:$0xff] }
  0x85   :  { %v2112_v60 = vld [vmem:[#allocation3 + $0x10] sm:$0xff]  ;;  %v2114_v61 = vld [vmem:[#allocation3 + $0x40] sm:$0xff]  ;;  %v2141_v5 = vrot.slane %v852_v4, 7  ;;  %v2147_v7 = vrot.slane %v853_v6, 7  ;;  %v1084_v29 = vld [vmem:[#allocation3 + $0x8] sm:$0xfc] }
  0x86   :  { %v2121_v62 = vld [vmem:[#allocation3 + $0x18] sm:$0xff]  ;;  %v2127_v63 = vld [vmem:[#allocation3 + $0x48] sm:$0xff]  ;;  %v2168_v14 = vrot.slane %v2114_v61, 7  ;;  %v2178_v16 = vrot.slane %v2112_v60, 7  ;;  %v1037_v22 = vld [vmem:[#allocation3 + $0x30] sm:$0xfc] }
  0x87   :  { %v2175_v15 = vrot.slane %v2121_v62, 7  ;;  %v2185_v17 = vrot.slane %v2127_v63, 7  ;;  %v1035_v23 = vld [vmem:[#allocation3] sm:$0xfc]  ;;  %v1045_v24 = vrot.slane %v2112_v60, 1  ;;  %v1049_v26 = vrot.slane %v1037_v22, 1 }
  0x88   :  { %v2194_v18 = vsel %vm74_vm6, %v2135_v3, %v2178_v16  ;;  %v2208_v20 = vsel %vm74_vm6, %v2133_v2, %v2168_v14  ;;  %v1050_v27 = vrot.slane %v2114_v61, 1  ;;  %v1044_v28 = vrot.slane %v1035_v23, 1  ;;  %v1086_v38 = vld [vmem:[#allocation3 + $0x38] sm:$0xfc] }
  0x89   :  { %v2036_v40 = vld [vmem:[#allocation3 + $0x50] sm:$0x1]  ;;  %v2203_v19 = vsel %vm74_vm6, %v2141_v5, %v2175_v15  ;;  %v2217_v21 = vsel %vm74_vm6, %v2147_v7, %v2185_v17  ;;  %v1092_v34 = vrot.slane %v1084_v29, 1  ;;  %v1093_v35 = vrot.slane %v2121_v62, 1 }
  0x8a   :  { %957 = vrot.lane.b32.xlu1 %v2036_v40, %s1712_s25  ;;  %v2062_v47 = vld [vmem:[#allocation3 + $0x28] sm:$0x1]  ;;  %v2092_v55 = vld [vmem:[#allocation3 + $0x58] sm:$0x1]  ;;  %v1038_v8 = vld [vmem:[#allocation3 + $0x50] sm:$0x3]  ;;  %v2234_v32 = vsel %vm1043_vm11, %v1049_v26, %v1050_v27  ;;  %v2237_v33 = vsel %vm1043_vm11, %v1044_v28, %v1045_v24 }
  0x8b   :  { %v2038_v41 = vld [vmem:[#allocation3 + $0x20] sm:$0x1]  ;;  %v2153_v10 = vrot.slane %v1038_v8, 1  ;;  %v1085_v12 = vld [vmem:[#allocation3 + $0x28] sm:$0x3]  ;;  %2561 = vst [vmem:[#allocation5_spill] sm:$0xff] %v2234_v32  ;;  %v2245_v36 = vsel %vm1043_vm11, %v1092_v34, %v1093_v35 }
  0x8c   :  { %951 = vrot.lane.b32.xlu0 %v2038_v41, %s1712_s25  ;;  %v1036_v9 = vld [vmem:[#allocation3 + $0x20] sm:$0x3]  ;;  %v2161_v13 = vrot.slane %v1085_v12, 1  ;;  %2562 = vst [vmem:[#allocation6_spill] sm:$0xff] %v2237_v33  ;;  %v1097_v42 = vrot.slane %v1086_v38, 1  ;;  %v1098_v44 = vrot.slane %v2127_v63, 1 }
  0x8d   :  { %2560 = vst [vmem:[#allocation4_spill] sm:$0xff] %v2153_v10  ;;  %v2155_v11 = vrot.slane %v1036_v9, 1  ;;  %v2249_v37 = vsel %vm1043_vm11, %v1050_v27, %v2153_v10  ;;  %v1087_v45 = vld [vmem:[#allocation3 + $0x58] sm:$0x3]  ;;  %v1322_v34 = vld [vmem:[%s2551_s3] ss:$0 sm:$0xff] }
  0x8e   :  { %983 = vrot.lane.b32.xlu1 %v2047_v43, %s1713_s24  ;;  %2563 = vst [vmem:[#allocation7_spill] sm:$0xff] %v2249_v37  ;;  %v2257_v39 = vsel %vm1043_vm11, %v1093_v35, %v2161_v13  ;;  %v2265_v46 = vsel %vm1043_vm11, %v1097_v42, %v1098_v44  ;;  %v2267_v48 = vrot.slane %v1087_v45, 1 }
  0x8f   :  { %v2226_v25 = vsel %vm1043_vm11, %v1045_v24, %v2155_v11  ;;  %2564 = vst [vmem:[#allocation8_spill] sm:$0xff] %v2265_v46 }
  0x90   :  { %981 = vrot.lane.b32.xlu0 %v2010_v31, %s1713_s24  ;;  %v2275_v49 = vsel %vm1043_vm11, %v1098_v44, %v2267_v48 }
  0x91   :  { %2565 = vst [vmem:[#allocation9_spill] sm:$0xff] %v2275_v49 }
  0x92   :  { %991 = vrot.lane.b32.xlu1 %v2062_v47, %s1713_s24 }
  0x94   :  { %989 = vrot.lane.b32.xlu0 %v2038_v41, %s1713_s24 }
  0x96   :  { %995 = vrot.lane.b32.xlu1 %v2080_v52, %s1713_s24 }
  0x98   :  { %993 = vrot.lane.b32.xlu0 %v2008_v30, %s1713_s24 }
  0x9a   :  { %1003 = vrot.lane.b32.xlu1 %v2092_v55, %s1713_s24 }
  0x9c   :  { %1001 = vrot.lane.b32.xlu0 %v2036_v40, %s1713_s24 }
  0x9e   :  { %949 = vrot.lane.b32.xlu1 %v2112_v60, %s1712_s25 }
  0xa0   :  { %955 = vrot.lane.b32.xlu0 %v2114_v61, %s1712_s25 }
  0xa2   :  { %987 = vrot.lane.b32.xlu1 %v2121_v62, %s1713_s24 }
  0xa4   :  { %985 = vrot.lane.b32.xlu0 %v2112_v60, %s1713_s24 }
  0xa6   :  { %999 = vrot.lane.b32.xlu1 %v2127_v63, %s1713_s24 }
  0xa8   :  { %997 = vrot.lane.b32.xlu0 %v2114_v61, %s1713_s24 }
  0xaa   :  { %828 = vrot.lane.b32.xlu1 %v2133_v2, %s1712_s25 }
  0xac   :  { %822 = vrot.lane.b32.xlu0 %v2135_v3, %s1712_s25 }
  0xae   :  { %890 = vrot.lane.b32.xlu1 %v2141_v5, %s1713_s24 }
  0xb0   :  { %888 = vrot.lane.b32.xlu0 %v2135_v3, %s1713_s24 }
  0xb2   :  { %902 = vrot.lane.b32.xlu1 %v2147_v7, %s1713_s24 }
  0xb4   :  { %900 = vrot.lane.b32.xlu0 %v2133_v2, %s1713_s24 }
  0xb6   :  { %1064 = vrot.lane.b32.xlu1 %v2153_v10, %s1712_s25 }
  0xb8   :  { %1058 = vrot.lane.b32.xlu0 %v2155_v11, %s1712_s25 }
  0xba   :  { %1136 = vrot.lane.b32.xlu1 %v2161_v13, %s1713_s24 }
  0xbc   :  { %1134 = vrot.lane.b32.xlu0 %v2155_v11, %s1713_s24 }
  0xbe   :  { %832 = vrot.lane.b32.xlu1 %v2168_v14, %s1712_s25 }
  0xc0   :  { %1146 = vrot.lane.b32.xlu0 %v2153_v10, %s1713_s24 }
  0xc2   :  { %898 = vrot.lane.b32.xlu1 %v2175_v15, %s1713_s24 }
  0xc4   :  { %826 = vrot.lane.b32.xlu0 %v2178_v16, %s1712_s25 }
  0xc6   :  { %910 = vrot.lane.b32.xlu1 %v2185_v17, %s1713_s24 }
  0xc8   :  { %896 = vrot.lane.b32.xlu0 %v2178_v16, %s1713_s24 }
  0xca   :  { %824 = vrot.lane.b32.xlu1 %v2194_v18, %s1712_s25 }
  0xcc   :  { %908 = vrot.lane.b32.xlu0 %v2168_v14, %s1713_s24 }
  0xce   :  { %894 = vrot.lane.b32.xlu1 %v2203_v19, %s1713_s24 }
  0xd0   :  { %830 = vrot.lane.b32.xlu0 %v2208_v20, %s1712_s25 }
  0xd2   :  { %906 = vrot.lane.b32.xlu1 %v2217_v21, %s1713_s24 }
  0xd4   :  { %892 = vrot.lane.b32.xlu0 %v2194_v18, %s1713_s24 }
  0xd6   :  { %1056 = vrot.lane.b32.xlu1 %v2226_v25, %s1712_s25 }
  0xd8   :  { %904 = vrot.lane.b32.xlu0 %v2208_v20, %s1713_s24 }
  0xda   :  { %1060 = vrot.lane.b32.xlu1 %v2234_v32, %s1712_s25 }
  0xdc   :  { %1054 = vrot.lane.b32.xlu0 %v2237_v33, %s1712_s25 }
  0xde   :  { %1128 = vrot.lane.b32.xlu1 %v2245_v36, %s1713_s24 }
  0xe0   :  { %1062 = vrot.lane.b32.xlu0 %v2249_v37, %s1712_s25 }
  0xe2   :  { %1132 = vrot.lane.b32.xlu1 %v2257_v39, %s1713_s24 }
  0xe4   :  { %1126 = vrot.lane.b32.xlu0 %v2237_v33, %s1713_s24 }
  0xe6   :  { %1140 = vrot.lane.b32.xlu1 %v2265_v46, %s1713_s24  ;;  %v1512_v56 = vpop.f32.mrf.mxu0 }
  0xe7   :  { %v1550_v0 = vpop.f32.mrf.mxu1 }
  0xe8   :  { %1130 = vrot.lane.b32.xlu0 %v2226_v25, %s1713_s24  ;;  %v233_v1 = vpop.f32.mrf.mxu0  ;;  %v324_v28 = vadd.f32 %v1550_v0, %v1512_v56 }
  0xe9   :  { %v318_v12 = vpop.f32.mrf.mxu1 }
  0xea   :  { %1144 = vrot.lane.b32.xlu1 %v2275_v49, %s1713_s24  ;;  %v319_v35 = vadd.f32 %v318_v12, %v233_v1 }
  0xeb   :  { %v1553_v24 = vpop.f32.mrf.mxu1 }
  0xec   :  { %1138 = vrot.lane.b32.xlu0 %v2234_v32, %s1713_s24  ;;  %v1515_v8 = vpop.f32.mrf.mxu0 }
  0xed   :  { %v328_v45 = vpop.f32.mrf.mxu1 }
  0xee   :  { %1148 = vrot.lane.b32.xlu1 %v2267_v48, %s1713_s24  ;;  %v243_v26 = vpop.f32.mrf.mxu0 }
  0xef   :  { %v329_v0 = vadd.f32 %v328_v45, %v243_v26 }
  0xf0   :  { %1142 = vrot.lane.b32.xlu0 %v2249_v37, %s1713_s24 }
  0xf2   :  { %1207 = vrot.lane.b32.xlu1 %v1357_v51, %s1712_s25 }
  0xf4   :  { %1186 = vrot.lane.b32.xlu0 %v1356_v50, %s1712_s25  ;;  %v2293_v53 = vpop.permute.xlu1 %953  ;;  %v2295_v54 = vpop.permute.xlu0 %947 }
  0xfc   :  { %v2297_v57 = vpop.permute.xlu1 %957 }
  0xfe   :  { %v2299_v58 = vpop.permute.xlu0 %951 }
 0x100   :  { %v2301_v4 = vpop.permute.xlu1 %983 }
 0x102   :  { %v982_v6 = vpop.permute.xlu0 %981 }
 0x103   :  { %v2305_v9 = vsel %vm912_vm12, %v982_v6, %v2301_v4  ;;  %v334_v6 = vadd.f32 %v1553_v24, %v1515_v8 }
 0x104   :  { %v2307_v22 = vpop.permute.xlu1 %991 }
 0x106   :  { %v990_v23 = vpop.permute.xlu0 %989 }
 0x107   :  { %v2311_v27 = vsel %vm912_vm12, %v990_v23, %v2307_v22 }
 0x108   :  { %v1588_v29 = vpop.f32.mrf.mxu0  ;;  %v2316_v42 = vpop.permute.xlu1 %995 }
 0x109   :  { %v444_v38 = vadd.f32 %v1588_v29, %v324_v28 }
 0x10a   :  { %v994_v44 = vpop.permute.xlu0 %993  ;;  %v424_v50 = vpop.f32.mrf.mxu0 }
 0x10b   :  { %v2320_v51 = vsel %vm912_vm12, %v994_v44, %v2316_v42  ;;  %v455_v23 = vadd.f32 %v1322_v34, %v444_v38  ;;  %v443_v37 = vadd.f32 %v424_v50, %v319_v35 }
 0x10c   :  { %v1591_v56 = vpop.f32.mrf.mxu0  ;;  %v2322_v33 = vpop.permute.xlu1 %1003 }
 0x10d   :  { %v459_v32 = vmax.f32 %v455_v23, 0.0  ;;  %v454_v49 = vadd.f32 %v1322_v34, %v443_v37  ;;  %v446_v46 = vadd.f32 %v1591_v56, %v334_v6  ;;  %v1353_v37 = vld [vmem:[%s2548_s4 + $0x170] sm:$0xff] }
 0x10e   :  { %v1002_v1 = vpop.permute.xlu0 %1001  ;;  %v434_v12 = vpop.f32.mrf.mxu0 }
 0x10f   :  { %v2326_v28 = vsel %vm912_vm12, %v1002_v1, %v2322_v33  ;;  %463 = vst [vmem:[#allocation2 + $0x9] sm:$0xff] %v459_v32  ;;  %v458_v29 = vmax.f32 %v454_v49, 0.0  ;;  %v457_v44 = vadd.f32 %v1322_v34, %v446_v46  ;;  %v445_v10 = vadd.f32 %v434_v12, %v329_v0  ;;  %v1352_v46 = vld [vmem:[%s2548_s4 + $0x168] sm:$0xff]  ;;  %v1349_v1 = vld [vmem:[%s2548_s4 + $0x150] sm:$0xff] }
 0x110   :  { %v2328_v35 = vpop.permute.xlu1 %949 }
 0x111   :  { %462 = vst [vmem:[#allocation2 + $0x1] sm:$0xff] %v458_v29  ;;  %v461_v8 = vmax.f32 %v457_v44, 0.0  ;;  %v456_v24 = vadd.f32 %v1322_v34, %v445_v10  ;;  %1624 = vmatprep.mubr.f32.mxu1 %v458_v29  ;;  %v1351_v34 = vld [vmem:[%s2548_s4 + $0x160] sm:$0xff] }
 0x112   :  { %v2330_v26 = vpop.permute.xlu0 %955  ;;  %1625 = vmatmul.mubr.f32.vlgmr.msra.gmra.mxu1 %v459_v32 }
 0x113   :  { %465 = vst [vmem:[#allocation2 + $0x21] sm:$0xff] %v461_v8  ;;  %v460_v38 = vmax.f32 %v456_v24, 0.0  ;;  %1669 = vmatpush3.msra.mxu1 %v2110_v59  ;;  %v1350_v59 = vld [vmem:[%s2548_s4 + $0x158] sm:$0xff]  ;;  %v1348_v24 = vld [vmem:[%s2548_s4 + $0x148] sm:$0xff] }
 0x114   :  { %1670 = vmatprep.subr.mxu1 %v1353_v37  ;;  %v2339_v10 = vpop.permute.xlu1 %987 }
 0x115   :  { %464 = vst [vmem:[#allocation2 + $0x19] sm:$0xff] %v460_v38  ;;  %1671 = vmatpush3.msra.mxu1 %v1353_v37  ;;  %1627 = vmatprep.mubr.f32.mxu1 %v460_v38 }
 0x116   :  { %v986_v49 = vpop.permute.xlu0 %985  ;;  %1672 = vmatprep.subr.mxu1 %v1352_v46  ;;  %1628 = vmatmul.mubr.f32.gmra.mxu1 %v461_v8 }
 0x117   :  { %v2346_v32 = vsel %vm912_vm12, %v986_v49, %v2339_v10  ;;  %1673 = vmatpush3.msra.mxu1 %v1352_v46  ;;  %v1347_v46 = vld [vmem:[%s2548_s4 + $0x140] sm:$0xff] }
 0x118   :  { %v466_v45 = vld [vmem:[#allocation2] sm:$0xff]  ;;  %v467_v50 = vld [vmem:[#allocation2 + $0x8] sm:$0xff]  ;;  %1674 = vmatprep.subr.mxu1 %v1351_v34  ;;  %v2351_v23 = vpop.permute.xlu1 %999 }
 0x119   :  { %v677_v6 = vld [vmem:[#allocation2 + $0x2] sm:$0xff]  ;;  %1662 = vmatprep.mubr.f32.mxu0 %v466_v45  ;;  %1675 = vmatpush3.msra.mxu1 %v1351_v34 }
 0x11a   :  { %v998_v56 = vpop.permute.xlu0 %997  ;;  %1700 = vmatprep.mubr.f32.mxu1 %v677_v6  ;;  %1663 = vmatmul.mubr.f32.vlgmr.msra.gmra.mxu0 %v467_v50 }
 0x11b   :  { %v2355_v0 = vsel %vm912_vm12, %v998_v56, %v2351_v23  ;;  %1676 = vmatprep.subr.mxu1 %v1350_v59 }
 0x11c   :  { %v468_v12 = vld [vmem:[#allocation2 + $0x18] sm:$0xff]  ;;  %v469_v29 = vld [vmem:[#allocation2 + $0x20] sm:$0xff]  ;;  %1677 = vmatpush3.msra.mxu1 %v1350_v59  ;;  %v829_v44 = vpop.permute.xlu1 %828 }
 0x11d   :  { %1665 = vmatprep.mubr.f32.mxu0 %v468_v12  ;;  %1678 = vmatprep.subr.mxu1 %v1349_v1  ;;  %v847_v49 = vmax.f32 %v2080_v52, %v829_v44  ;;  %v846_v45 = vmax.f32 %v2008_v30, %v829_v44  ;;  %v1345_v52 = vld [vmem:[%s2548_s4 + $0x130] sm:$0xff] }
 0x11e   :  { %v823_v8 = vpop.permute.xlu0 %822  ;;  %1666 = vmatmul.mubr.f32.gmra.mxu0 %v469_v29  ;;  %1679 = vmatpush3.msra.mxu1 %v1349_v1 }
 0x11f   :  { %v840_v37 = vmax.f32 %v2010_v31, %v823_v8  ;;  %v841_v38 = vmax.f32 %v2047_v43, %v823_v8  ;;  %1680 = vmatprep.subr.mxu1 %v1348_v24  ;;  %v1346_v31 = vld [vmem:[%s2548_s4 + $0x138] sm:$0xff]  ;;  %v883_v30 = vmax.f32 %v847_v49, %v2147_v7  ;;  %v1344_v8 = vld [vmem:[%s2548_s4 + $0x128] sm:$0xff] }
 0x120   :  { %v891_v50 = vpop.permute.xlu1 %890  ;;  %1681 = vmatpush3.msra.mxu1 %v1348_v24 }
 0x121   :  { %v876_v34 = vmax.f32 %v840_v37, %v2135_v3  ;;  %v877_v59 = vmax.f32 %v841_v38, %v2141_v5  ;;  %1682 = vmatprep.subr.mxu1 %v1347_v46  ;;  %v882_v5 = vmax.f32 %v846_v45, %v2133_v2  ;;  %v1343_v2 = vld [vmem:[%s2548_s4 + $0x120] sm:$0xff]  ;;  %v1342_v45 = vld [vmem:[%s2548_s4 + $0x118] sm:$0xff] }
 0x122   :  { %v889_v6 = vpop.permute.xlu0 %888  ;;  %1683 = vmatpush3.msra.mxu1 %v1347_v46 }
 0x123   :  { %v932_v43 = vmax.f32 %v877_v59, %v891_v50  ;;  %v913_v56 = vsel %vm912_vm12, %v889_v6, %v891_v50  ;;  %1684 = vmatprep.subr.mxu1 %v1346_v31  ;;  %v1341_v6 = vld [vmem:[%s2548_s4 + $0x110] sm:$0xff] }
 0x124   :  { %v931_v1 = vmax.f32 %v876_v34, %v913_v56  ;;  %v903_v29 = vpop.permute.xlu1 %902  ;;  %1685 = vmatpush3.msra.mxu1 %v1346_v31  ;;  %v1340_v56 = vld [vmem:[%s2548_s4 + $0x108] sm:$0xff] }
 0x125   :  { %v2380_v3 = vmax.f32 %v932_v43, %v2295_v54  ;;  %v938_v24 = vmax.f32 %v883_v30, %v903_v29  ;;  %1686 = vmatprep.subr.mxu1 %v1345_v52 }
 0x126   :  { %v2385_v12 = vmax.f32 %v931_v1, %v2295_v54  ;;  %v901_v44 = vpop.permute.xlu0 %900  ;;  %1687 = vmatpush3.msra.mxu1 %v1345_v52  ;;  %v1339_v1 = vld [vmem:[%s2548_s4 + $0x100] sm:$0xff] }
 0x127   :  { %v916_v37 = vsel %vm912_vm12, %v901_v44, %v903_v29  ;;  %v1024_v7 = vmax.f32 %v2380_v3, %v2301_v4  ;;  %v2399_v46 = vmax.f32 %v938_v24, %v2293_v53  ;;  %1688 = vmatprep.subr.mxu1 %v1344_v8  ;;  %v679_v44 = vld [vmem:[#allocation2 + $0x1a] sm:$0xff] }
 0x128   :  { %v937_v38 = vmax.f32 %v882_v5, %v916_v37  ;;  %v2404_v34 = vpop.permute.xlu1 %1064  ;;  %1689 = vmatpush3.msra.mxu1 %v1344_v8  ;;  %v678_v5 = vld [vmem:[#allocation2 + $0xa] sm:$0xff] }
 0x129   :  { %1690 = vmatprep.subr.mxu1 %v1343_v2 }
 0x12a   :  { %v2402_v49 = vmax.f32 %v937_v38, %v2293_v53  ;;  %v2406_v59 = vpop.permute.xlu0 %1058  ;;  %1691 = vmatpush3.msra.mxu1 %v1343_v2  ;;  %v680_v2 = vld [vmem:[#allocation2 + $0x22] sm:$0xff] }
 0x12b   :  { %1692 = vmatprep.subr.mxu1 %v1342_v45 }
 0x12c   :  { %v2418_v31 = vpop.permute.xlu1 %1136  ;;  %1693 = vmatpush3.msra.mxu1 %v1342_v45 }
 0x12d   :  { %1694 = vmatprep.subr.mxu1 %v1341_v6 }
 0x12e   :  { %v2420_v43 = vpop.permute.xlu0 %1134  ;;  %1695 = vmatpush3.msra.mxu1 %v1341_v6 }
 0x12f   :  { %1696 = vmatprep.subr.mxu1 %v1340_v56  ;;  %v1152_v4 = vsel %vm912_vm12, %v2420_v43, %v2418_v31 }
 0x130   :  { %v833_v52 = vpop.permute.xlu1 %832  ;;  %1697 = vmatpush3.msra.mxu1 %v1340_v56 }
 0x131   :  { %1698 = vmatprep.subr.mxu1 %v1339_v1  ;;  %v851_v29 = vmax.f32 %v2092_v55, %v833_v52  ;;  %v850_v55 = vmax.f32 %v2036_v40, %v833_v52 }
 0x132   :  { %v2428_v30 = vpop.permute.xlu0 %1146  ;;  %1699 = vmatpush3.msra.mxu1 %v1339_v1 }
 0x133   :  { %1701 = vmatmul.mubr.f32.vlgmr.msra.gmra.mxu1 %v678_v5  ;;  %v887_v56 = vmax.f32 %v851_v29, %v2185_v17  ;;  %v886_v17 = vmax.f32 %v850_v55, %v2168_v14 }
 0x134   :  { %v899_v8 = vpop.permute.xlu1 %898  ;;  %1703 = vmatprep.mubr.f32.mxu1 %v679_v44 }
 0x136   :  { %v827_v24 = vpop.permute.xlu0 %826 }
 0x137   :  { %v844_v37 = vmax.f32 %v2038_v41, %v827_v24  ;;  %v845_v38 = vmax.f32 %v2062_v47, %v827_v24  ;;  %1704 = vmatmul.mubr.f32.gmra.mxu1 %v680_v2 }
 0x138   :  { %v911_v1 = vpop.permute.xlu1 %910 }
 0x139   :  { %v880_v45 = vmax.f32 %v844_v37, %v2178_v16  ;;  %v881_v6 = vmax.f32 %v845_v38, %v2175_v15  ;;  %v942_v54 = vmax.f32 %v887_v56, %v911_v1 }
 0x13a   :  { %v897_v53 = vpop.permute.xlu0 %896 }
 0x13b   :  { %v936_v5 = vmax.f32 %v881_v6, %v899_v8  ;;  %v915_v44 = vsel %vm912_vm12, %v897_v53, %v899_v8  ;;  %v976_v47 = vmax.f32 %v942_v54, %v2297_v57 }
 0x13c   :  { %v935_v50 = vmax.f32 %v880_v45, %v915_v44  ;;  %v825_v24 = vpop.permute.xlu1 %824 }
 0x13d   :  { %v970_v41 = vmax.f32 %v936_v5, %v2299_v58  ;;  %v1034_v37 = vmax.f32 %v976_v47, %v2322_v33  ;;  %v843_v40 = vmax.f32 %v2121_v62, %v825_v24  ;;  %v842_v54 = vmax.f32 %v2112_v60, %v825_v24 }
 0x13e   :  { %v969_v16 = vmax.f32 %v935_v50, %v2299_v58  ;;  %v909_v15 = vpop.permute.xlu0 %908 }
 0x13f   :  { %v1028_v29 = vmax.f32 %v970_v41, %v2307_v22  ;;  %v918_v53 = vsel %vm912_vm12, %v909_v15, %v911_v1  ;;  %v879_v38 = vmax.f32 %v843_v40, %v2203_v19  ;;  %v2450_v2 = vmax.f32 %v1034_v37, %v2404_v34 }
 0x140   :  { %v1027_v52 = vmax.f32 %v969_v16, %v2311_v27  ;;  %v941_v8 = vmax.f32 %v886_v17, %v918_v53  ;;  %v895_v58 = vpop.permute.xlu1 %894  ;;  %v878_v19 = vmax.f32 %v842_v54, %v2194_v18 }
 0x141   :  { %v934_v22 = vmax.f32 %v879_v38, %v895_v58 }
 0x142   :  { %v831_v50 = vpop.permute.xlu0 %830  ;;  %v975_v14 = vmax.f32 %v941_v8, %v2297_v57  ;;  %v1076_v8 = vmax.f32 %v1027_v52, %v2406_v59 }
 0x143   :  { %v849_v33 = vmax.f32 %v2127_v63, %v831_v50  ;;  %v968_v27 = vmax.f32 %v934_v22, %v2328_v35  ;;  %v848_v60 = vmax.f32 %v2114_v61, %v831_v50  ;;  %v2566_v50 = vmax.f32 %v2399_v46, %v2316_v42 }
 0x144   :  { %v1033_v62 = vmax.f32 %v975_v14, %v2326_v28  ;;  %v907_v6 = vpop.permute.xlu1 %906 }
 0x145   :  { %v885_v45 = vmax.f32 %v849_v33, %v2217_v21  ;;  %v1026_v57 = vmax.f32 %v968_v27, %v2339_v10  ;;  %v884_v44 = vmax.f32 %v848_v60, %v2208_v20 }
 0x146   :  { %v893_v56 = vpop.permute.xlu0 %892  ;;  %v2462_v5 = vmax.f32 %v1033_v62, %v2404_v34  ;;  %v2569_v62 = vld [vmem:[#allocation4_spill] sm:$0xff] }
 0x147   :  { %v940_v1 = vmax.f32 %v885_v45, %v907_v6  ;;  %v914_v55 = vsel %vm912_vm12, %v893_v56, %v895_v58  ;;  %v2570_v45 = vld [vmem:[#allocation6_spill] sm:$0xff] }
 0x148   :  { %v933_v63 = vmax.f32 %v878_v19, %v914_v55  ;;  %v1057_v18 = vpop.permute.xlu1 %1056  ;;  %v1124_v43 = vmax.f32 %v2462_v5, %v2569_v62  ;;  %v2574_v5 = vld [vmem:[#allocation7_spill] sm:$0xff] }
 0x149   :  { %v974_v28 = vmax.f32 %v940_v1, %v2330_v26  ;;  %v2573_v1 = vld [vmem:[#allocation5_spill] sm:$0xff] }
 0x14a   :  { %v967_v21 = vmax.f32 %v933_v63, %v2328_v35  ;;  %v905_v41 = vpop.permute.xlu0 %904  ;;  %v1077_v35 = vmax.f32 %v1028_v29, %v2406_v59  ;;  %v2567_v29 = vmax.f32 %v2385_v12, %v2305_v9 }
 0x14b   :  { %v917_v61 = vsel %vm912_vm12, %v905_v41, %v907_v6  ;;  %v1032_v47 = vmax.f32 %v974_v28, %v2351_v23  ;;  %v1118_v23 = vmax.f32 %v1076_v8, %v2155_v11  ;;  %v1125_v11 = vmax.f32 %v2450_v2, %v2267_v48  ;;  %v2571_v2 = vld [vmem:[#allocation8_spill] sm:$0xff]  ;;  %v2572_v6 = vld [vmem:[#allocation9_spill] sm:$0xff] }
 0x14c   :  { %v1025_v16 = vmax.f32 %v967_v21, %v2346_v32  ;;  %v939_v24 = vmax.f32 %v884_v44, %v917_v61  ;;  %v1061_v34 = vpop.permute.xlu1 %1060 }
 0x14d   :  { %v1079_v14 = vmax.f32 %v2566_v50, %v1061_v34  ;;  %v1172_v27 = vmax.f32 %v1118_v23, %v1152_v4 }
 0x14e   :  { %v973_v10 = vmax.f32 %v939_v24, %v2330_v26  ;;  %v1055_v15 = vpop.permute.xlu0 %1054  ;;  %v1119_v26 = vmax.f32 %v1077_v35, %v2161_v13  ;;  %v1074_v58 = vmax.f32 %v1025_v16, %v1057_v18  ;;  %v2568_v13 = vmax.f32 %v2402_v49, %v2320_v51 }
 0x14f   :  { %v1073_v32 = vmax.f32 %v1024_v7, %v1055_v15  ;;  %v1072_v59 = vmax.f32 %v2567_v29, %v1055_v15  ;;  %v1121_v51 = vmax.f32 %v1079_v14, %v2571_v2 }
 0x150   :  { %v1031_v17 = vmax.f32 %v973_v10, %v2355_v0  ;;  %v1129_v37 = vpop.permute.xlu1 %1128  ;;  %v1075_v0 = vmax.f32 %v1026_v57, %v1057_v18  ;;  %v1078_v7 = vmax.f32 %v2568_v13, %v1061_v34  ;;  %v1173_v9 = vmax.f32 %v1119_v26, %v2418_v31 }
 0x151   :  { %v1115_v42 = vmax.f32 %v1073_v32, %v2245_v36  ;;  %v1116_v12 = vmax.f32 %v1074_v58, %v2226_v25  ;;  %v1114_v19 = vmax.f32 %v1072_v59, %v2570_v45 }
 0x152   :  { %v1063_v40 = vpop.permute.xlu0 %1062  ;;  %v1117_v33 = vmax.f32 %v1075_v0, %v2257_v39  ;;  %v1120_v55 = vmax.f32 %v1078_v7, %v2573_v1 }
 0x153   :  { %v1081_v3 = vmax.f32 %v1032_v47, %v1063_v40  ;;  %v1080_v46 = vmax.f32 %v1031_v17, %v1063_v40  ;;  %v1169_v57 = vmax.f32 %v1115_v42, %v1129_v37 }
 0x154   :  { %v1133_v20 = vpop.permute.xlu1 %1132 }
 0x155   :  { %v1123_v31 = vmax.f32 %v1081_v3, %v2572_v6  ;;  %v1122_v63 = vmax.f32 %v1080_v46, %v2574_v5  ;;  %v1171_v28 = vmax.f32 %v1117_v33, %v1133_v20 }
 0x156   :  { %v1127_v53 = vpop.permute.xlu0 %1126 }
 0x157   :  { %v1150_v48 = vsel %vm912_vm12, %v1127_v53, %v1129_v37 }
 0x158   :  { %v1141_v38 = vpop.permute.xlu1 %1140  ;;  %v1168_v44 = vmax.f32 %v1114_v19, %v1150_v48 }
 0x159   :  { %v1175_v21 = vmax.f32 %v1121_v51, %v1141_v38 }
 0x15a   :  { %v1131_v54 = vpop.permute.xlu0 %1130 }
 0x15b   :  { %v1151_v49 = vsel %vm912_vm12, %v1131_v54, %v1133_v20 }
 0x15c   :  { %v1145_v52 = vpop.permute.xlu1 %1144  ;;  %v1170_v18 = vmax.f32 %v1116_v12, %v1151_v49 }
 0x15d   :  { %v1177_v41 = vmax.f32 %v1123_v31, %v1145_v52 }
 0x15e   :  { %v1139_v22 = vpop.permute.xlu0 %1138 }
 0x15f   :  { %v1153_v25 = vsel %vm912_vm12, %v1139_v22, %v1141_v38 }
 0x160   :  { %v1149_v36 = vpop.permute.xlu1 %1148  ;;  %v1174_v61 = vmax.f32 %v1120_v55, %v1153_v25 }
 0x161   :  { %v1155_v39 = vsel %vm912_vm12, %v2428_v30, %v1149_v36  ;;  %v1179_v16 = vmax.f32 %v1125_v11, %v1149_v36 }
 0x162   :  { %v1143_v60 = vpop.permute.xlu0 %1142  ;;  %v1178_v47 = vmax.f32 %v1124_v43, %v1155_v39 }
 0x163   :  { %v1154_v56 = vsel %vm912_vm12, %v1143_v60, %v1145_v52 }
 0x164   :  { %v1176_v24 = vmax.f32 %v1122_v63, %v1154_v56  ;;  %v1208_v34 = vpop.permute.xlu1 %1207 }
 0x166   :  { %v1187_v10 = vpop.permute.xlu0 %1186 }
 0x167   :  { %v1190_v15 = vmul.f32 %v1187_v10, %v1169_v57  ;;  %v1192_v30 = vmul.f32 %v1187_v10, %v1171_v28  ;;  %v1189_v17 = vmul.f32 %v1187_v10, %v1168_v44  ;;  %v1191_v40 = vmul.f32 %v1187_v10, %v1170_v18 }
 0x168   :  { %v1194_v53 = vmul.f32 %v1187_v10, %v1173_v9  ;;  %v1193_v35 = vmul.f32 %v1187_v10, %v1172_v27  ;;  %v1196_v37 = vmul.f32 %v1187_v10, %v1175_v21  ;;  %v1198_v8 = vmul.f32 %v1187_v10, %v1177_v41 }
 0x169   :  { %v1211_v54 = vadd.f32 %v1208_v34, %v1190_v15  ;;  %v1213_v20 = vadd.f32 %v1208_v34, %v1192_v30  ;;  %v1210_v32 = vadd.f32 %v1208_v34, %v1189_v17  ;;  %v1212_v38 = vadd.f32 %v1208_v34, %v1191_v40 }
 0x16a   :  { %v1215_v26 = vadd.f32 %v1208_v34, %v1194_v53  ;;  %v1214_v23 = vadd.f32 %v1208_v34, %v1193_v35  ;;  %v1217_v58 = vadd.f32 %v1208_v34, %v1196_v37  ;;  %v1219_v0 = vadd.f32 %v1208_v34, %v1198_v8 }
 0x16b   :  { %v1237_v50 = vrot.slane %v1211_v54, 1  ;;  %v1238_v14 = vrot.slane %v1213_v20, 1  ;;  %v1234_v29 = vrot.slane %v1210_v32, 1  ;;  %v1235_v59 = vrot.slane %v1212_v38, 1 }
 0x16c   :  { %v1242_v52 = vrot.slane %v1215_v26, 1  ;;  %v1240_v22 = vrot.slane %v1214_v23, 1  ;;  %v1247_v4 = vrot.slane %v1217_v58, 1  ;;  %v1248_v3 = vrot.slane %v1219_v0, 1 }
 0x16d   :  { %v1239_v11 = vsel %vm1043_vm11, %v1237_v50, %v1238_v14  ;;  %v1236_v13 = vsel %vm1043_vm11, %v1234_v29, %v1235_v59  ;;  %v1195_v7 = vmul.f32 %v1187_v10, %v1174_v61  ;;  %v1197_v42 = vmul.f32 %v1187_v10, %v1176_v24 }
 0x16e   :  { %1256 = vrot.lane.b32.xlu1 %v1239_v11, %s1713_s24  ;;  %1254 = vrot.lane.b32.xlu0 %v1236_v13, %s1713_s24  ;;  %v1243_v46 = vsel %vm1043_vm11, %v1238_v14, %v1242_v52  ;;  %v1241_v9 = vsel %vm1043_vm11, %v1235_v59, %v1240_v22  ;;  %v1249_v12 = vsel %vm1043_vm11, %v1247_v4, %v1248_v3 }
 0x16f   :  { %v1216_v33 = vadd.f32 %v1208_v34, %v1195_v7  ;;  %v1218_v62 = vadd.f32 %v1208_v34, %v1197_v42  ;;  %v1200_v43 = vmul.f32 %v1187_v10, %v1179_v16  ;;  %v1199_v27 = vmul.f32 %v1187_v10, %v1178_v47  ;;  %v1355_v47 = vld [vmem:[%s2552_s5] ss:$0 sm:$0xff] }
 0x171   :  { %v1244_v45 = vrot.slane %v1216_v33, 1  ;;  %v1245_v19 = vrot.slane %v1218_v62, 1  ;;  %v1221_v48 = vadd.f32 %v1208_v34, %v1200_v43  ;;  %v1220_v2 = vadd.f32 %v1208_v34, %v1199_v27 }
 0x172   :  { %1260 = vrot.lane.b32.xlu1 %v1243_v46, %s1713_s24  ;;  %1258 = vrot.lane.b32.xlu0 %v1241_v9, %s1713_s24 }
 0x173   :  { %v1246_v51 = vsel %vm1043_vm11, %v1244_v45, %v1245_v19  ;;  %v1252_v49 = vrot.slane %v1221_v48, 1  ;;  %v1250_v36 = vrot.slane %v1220_v2, 1 }
 0x175   :  { %v1253_v60 = vsel %vm1043_vm11, %v1248_v3, %v1252_v49  ;;  %v1251_v6 = vsel %vm1043_vm11, %v1245_v19, %v1250_v36 }
 0x176   :  { %1264 = vrot.lane.b32.xlu1 %v1249_v12, %s1713_s24  ;;  %1262 = vrot.lane.b32.xlu0 %v1246_v51, %s1713_s24 }
 0x17a   :  { %1268 = vrot.lane.b32.xlu1 %v1253_v60, %s1713_s24  ;;  %1266 = vrot.lane.b32.xlu0 %v1251_v6, %s1713_s24 }
 0x1d2   :  { %v1626_v31 = vpop.f32.mrf.mxu1 }
 0x1d4   :  { %v573_v1 = vpop.f32.mrf.mxu1 }
 0x1d6   :  { %v1629_v63 = vpop.f32.mrf.mxu1 }
 0x1d8   :  { %v583_v44 = vpop.f32.mrf.mxu1 }
 0x1da   :  { %v1664_v56 = vpop.f32.mrf.mxu0 }
 0x1db   :  { %v664_v21 = vadd.f32 %v1664_v56, %v1626_v31 }
 0x1dc   :  { %v658_v5 = vpop.f32.mrf.mxu0 }
 0x1dd   :  { %v659_v16 = vadd.f32 %v658_v5, %v573_v1 }
 0x1de   :  { %v1667_v28 = vpop.f32.mrf.mxu0 }
 0x1df   :  { %v674_v15 = vadd.f32 %v1667_v28, %v1629_v63 }
 0x1e0   :  { %v1257_v25 = vpop.permute.xlu1 %1256  ;;  %v1255_v39 = vpop.permute.xlu0 %1254 }
 0x1e1   :  { %v668_v10 = vpop.f32.mrf.mxu0  ;;  %v1270_v38 = vsel %vm912_vm12, %v1255_v39, %v1257_v25 }
 0x1e2   :  { %v669_v35 = vadd.f32 %v668_v10, %v583_v44 }
 0x1e4   :  { %v1261_v55 = vpop.permute.xlu1 %1260  ;;  %v1259_v57 = vpop.permute.xlu0 %1258 }
 0x1e5   :  { %v1271_v40 = vsel %vm912_vm12, %v1259_v57, %v1261_v55 }
 0x1e8   :  { %v1265_v18 = vpop.permute.xlu1 %1264  ;;  %v1263_v41 = vpop.permute.xlu0 %1262 }
 0x1e9   :  { %v1272_v59 = vsel %vm912_vm12, %v1263_v41, %v1265_v18 }
 0x1ec   :  { %v1269_v37 = vpop.permute.xlu1 %1268  ;;  %v1267_v8 = vpop.permute.xlu0 %1266 }
 0x1ed   :  { %v1273_v50 = vsel %vm912_vm12, %v1267_v8, %v1269_v37 }
 0x1f3   :  { %v1702_v61 = vpop.f32.mrf.mxu1 }
 0x1f4   :  { %v784_v24 = vadd.f32 %v1702_v61, %v664_v21 }
 0x1f5   :  { %v764_v34 = vpop.f32.mrf.mxu1 }
 0x1f6   :  { %v795_v30 = vadd.f32 %v1355_v47, %v784_v24  ;;  %v783_v17 = vadd.f32 %v764_v34, %v659_v16 }
 0x1f7   :  { %v1705_v53 = vpop.f32.mrf.mxu1 }
 0x1f8   :  { %v1279_v54 = vadd.f32 %v1271_v40, %v795_v30  ;;  %v794_v20 = vadd.f32 %v1355_v47, %v783_v17  ;;  %v786_v32 = vadd.f32 %v1705_v53, %v674_v15 }
 0x1f9   :  { %v774_v26 = vpop.f32.mrf.mxu1 }
 0x1fa   :  { %1283 = vst [vmem:[%s2553_s8 + $0x8] sm:$0xff] %v1279_v54  ;;  %v1278_v23 = vadd.f32 %v1270_v38, %v794_v20  ;;  %v797_v58 = vadd.f32 %v1355_v47, %v786_v32  ;;  %v785_v0 = vadd.f32 %v774_v26, %v669_v35 }
 0x1fc   :  { %1282 = vst [vmem:[%s2553_s8] sm:$0xff] %v1278_v23  ;;  %v1281_v14 = vadd.f32 %v1273_v50, %v797_v58  ;;  %v796_v29 = vadd.f32 %v1355_v47, %v785_v0 }
 0x1fe   :  { %1285 = vst [vmem:[%s2553_s8 + $0x18] sm:$0xff] %v1281_v14  ;;  %v1280_v52 = vadd.f32 %v1272_v59, %v796_v29 }
 0x200   :  { %1284 = vst [vmem:[%s2553_s8 + $0x10] sm:$0xff] %v1280_v52 }

</bundles_post_ra>
